<compile_context>
chip_gen: v6e
topology: v6e:2x2x1
jax: 0.10.0
libtpu: 0.0.40
codegen_flags: <defaults>
</compile_context>

<pallas_src>
import functools
import math

import jax
import jax.numpy as jnp
from jax.experimental import pallas as pl
from jax.experimental.pallas import tpu as pltpu


def _layernorm(x, g, b, eps=1e-5):
    mu = jnp.mean(x, axis=-1, keepdims=True)
    var = jnp.mean((x - mu) ** 2, axis=-1, keepdims=True)
    return (x - mu) * jax.lax.rsqrt(var + eps) * g + b


def _gelu_exact(x):
    # PyTorch 'gelu' (approximate='none'): 0.5*x*(1+erf(x/sqrt(2)))
    return 0.5 * x * (1.0 + jax.lax.erf(x * (1.0 / math.sqrt(2.0))))


def att_other_gaze_kernel(
    x_ref,        # (B, S, 3F)   f32   concat(right, middle, left)
    w_in_ref,     # (3F, H)      bf16
    w_qkv_ref,    # (L, H, 3H)   bf16  (Q columns pre-scaled by 1/sqrt(dh))
    w_oth_ref,    # (L, 3, H, H) bf16  [Wo^T, W1^T, W2^T]
    vecs_ref,     # (L, 10, H)   f32   [bq*, bk, bv, bo, ln1g, ln1b, b1, b2, ln2g, ln2b]
    fin_ref,      # (3, H)       f32   [b_in, final-LN gamma, final-LN beta]
    clf_ref,      # (H+1, O)     f32   [Wc^T ; bc]
    out_ref,      # (B, O)       f32
    *, num_layers, num_heads,
):
    B, S, F3 = x_ref.shape
    H = w_in_ref.shape[1]
    dh = H // num_heads
    R = B * S

    # ---- input layer: Linear + ReLU (one (R,3F)@(3F,H) matmul) -------------
    x = x_ref[...].reshape(R, F3).astype(jnp.bfloat16)
    h = jnp.dot(x, w_in_ref[...], preferred_element_type=jnp.float32)
    h = jnp.maximum(h + fin_ref[0:1, :], 0.0)                     # (R, H) f32

    # ---- transformer encoder layers (post-norm) ----------------------------
    for l in range(num_layers):
        vec = vecs_ref[l]                                         # (10, H) f32
        w_oth = w_oth_ref[l]                                      # (3, H, H) bf16
        wo, w1, w2 = w_oth[0], w_oth[1], w_oth[2]

        # --- multi-head self-attention: ONE QKV matmul, ONE out-proj matmul
        qkv = jnp.dot(h.astype(jnp.bfloat16), w_qkv_ref[l],
                      preferred_element_type=jnp.float32)         # (R, 3H)
        q = (qkv[:, 0:H] + vec[0:1, :]).reshape(B, S, H).astype(jnp.bfloat16)
        k = (qkv[:, H:2 * H] + vec[1:2, :]).reshape(B, S, H).astype(jnp.bfloat16)
        v = (qkv[:, 2 * H:3 * H] + vec[2:3, :]).reshape(B, S, H).astype(jnp.bfloat16)

        ctx = []
        for hd in range(num_heads):
            lo = hd * dh
            qh = q[:, :, lo:lo + dh]                              # (B, S, dh)
            kh = k[:, :, lo:lo + dh]
            vh = v[:, :, lo:lo + dh]
            s = jnp.einsum('bqd,bkd->bqk', qh, kh,
                           preferred_element_type=jnp.float32)    # (B, S, S)
            s = s - jnp.max(s, axis=-1, keepdims=True)
            p = jnp.exp(s)
            p = p * pl.reciprocal(jnp.sum(p, axis=-1, keepdims=True), approx=True)
            ctx.append(jnp.einsum('bqk,bkd->bqd', p.astype(jnp.bfloat16), vh,
                                  preferred_element_type=jnp.float32))
        ctx = jnp.concatenate(ctx, axis=-1).reshape(R, H)         # (R, H) f32
        attn = jnp.dot(ctx.astype(jnp.bfloat16), wo,
                       preferred_element_type=jnp.float32) + vec[3:4, :]
        h = _layernorm(h + attn, vec[4:5, :], vec[5:6, :])

        # --- feed-forward: two (R,H)@(H,H) matmuls, exact GELU ---------------
        ff = jnp.dot(h.astype(jnp.bfloat16), w1,
                     preferred_element_type=jnp.float32) + vec[6:7, :]
        ff = _gelu_exact(ff)
        ff = jnp.dot(ff.astype(jnp.bfloat16), w2,
                     preferred_element_type=jnp.float32) + vec[7:8, :]
        h = _layernorm(h + ff, vec[8:9, :], vec[9:10, :])

    # ---- final LayerNorm of the TransformerEncoder --------------------------
    h = _layernorm(h, fin_ref[1:2, :], fin_ref[2:3, :])

    # ---- mean over seq, classifier Linear + Sigmoid --------------------------
    pooled = jnp.mean(h.reshape(B, S, H), axis=1)                 # (B, H)
    clf = clf_ref[...]
    logits = jnp.dot(pooled, clf[0:H, :],
                     preferred_element_type=jnp.float32) + clf[H:H + 1, :]
    out_ref[...] = jax.nn.sigmoid(logits).astype(out_ref.dtype)


def init_params(key, fea_dim, hidden_dim, layer_num, out_dim):
    """Deterministic synthetic parameters (logical shapes match the nn.Module)."""
    H, F, L, O = hidden_dim, fea_dim, layer_num, out_dim
    ks = jax.random.split(key, 6)

    def w(k, shape, fan_in):
        return jax.random.normal(k, shape, jnp.float32) / math.sqrt(fan_in)

    p = {}
    p['w_in'] = w(ks[0], (3 * F, H), 3 * F)        # Linear(fea_dim*3, hidden)^T
    p['b_in'] = jnp.zeros((H,), jnp.float32)
    p['wqkv'] = w(ks[1], (L, H, 3 * H), H)         # in_proj_weight^T per layer
    p['bqkv'] = jnp.zeros((L, 3 * H), jnp.float32)
    p['wo']   = w(ks[2], (L, H, H), H)             # out_proj.weight^T
    p['bo']   = jnp.zeros((L, H), jnp.float32)
    p['ln1g'] = jnp.ones((L, H), jnp.float32)
    p['ln1b'] = jnp.zeros((L, H), jnp.float32)
    p['ln2g'] = jnp.ones((L, H), jnp.float32)
    p['ln2b'] = jnp.zeros((L, H), jnp.float32)
    p['w1']   = w(ks[3], (L, H, H), H)             # linear1.weight^T (ffn == H)
    p['b1']   = jnp.zeros((L, H), jnp.float32)
    p['w2']   = w(ks[4], (L, H, H), H)             # linear2.weight^T
    p['b2']   = jnp.zeros((L, H), jnp.float32)
    p['fng']  = jnp.ones((H,), jnp.float32)
    p['fnb']  = jnp.zeros((H,), jnp.float32)
    p['wc']   = w(ks[5], (H, O), H)                # clf Linear^T
    p['bc']   = jnp.zeros((O,), jnp.float32)
    return p


def pack_params(p, num_heads):
    """Pack 19 parameter tensors into 6 VMEM slabs (fewer DMA descriptors),
    cast matmul weights to bf16 and fold the 1/sqrt(dh) attention scale into
    the Q projection weights/bias."""
    H = p['w_in'].shape[1]
    dh = H // num_heads
    scale = 1.0 / math.sqrt(dh)

    wqkv = p['wqkv'].at[:, :, :H].multiply(scale)                   # scale Q cols
    bq = p['bqkv'][:, :H] * scale
    bk = p['bqkv'][:, H:2 * H]
    bv = p['bqkv'][:, 2 * H:]

    vecs = jnp.stack([bq, bk, bv, p['bo'], p['ln1g'], p['ln1b'],
                      p['b1'], p['b2'], p['ln2g'], p['ln2b']], axis=1)   # (L,10,H)
    w_oth = jnp.stack([p['wo'], p['w1'], p['w2']], axis=1)               # (L,3,H,H)
    fin = jnp.stack([p['b_in'], p['fng'], p['fnb']], axis=0)             # (3,H)
    clf = jnp.concatenate([p['wc'], p['bc'][None, :]], axis=0)           # (H+1,O)

    return {
        'w_in': p['w_in'].astype(jnp.bfloat16),
        'w_qkv': wqkv.astype(jnp.bfloat16),
        'w_oth': w_oth.astype(jnp.bfloat16),
        'vecs': vecs.astype(jnp.float32),
        'fin': fin.astype(jnp.float32),
        'clf': clf.astype(jnp.float32),
    }


def _cost_estimate(B, S, F3, H, L, nh, O, args, out_bytes):
    R = B * S
    dh = H // nh
    flops = (2 * R * F3 * H
             + L * (2 * R * H * 3 * H          # qkv projection
                    + 4 * B * nh * S * S * dh  # scores + context
                    + 2 * R * H * H * 3)       # wo, w1, w2
             + 2 * B * H * O)
    transcendentals = L * (R * H + B * nh * S * S) + B * O
    bytes_accessed = sum(int(a.size) * a.dtype.itemsize for a in args) + out_bytes
    return pl.CostEstimate(flops=int(flops),
                           transcendentals=int(transcendentals),
                           bytes_accessed=int(bytes_accessed))


def att_other_gaze_forward(talk, candi, right, middle, left, packed,
                           *, layer_num, tfm_head, out_dim):
    """Matches ATT_OTHER_GAZE.forward: only right/middle/left are used."""
    del talk, candi
    # torch.cat([right, middle, left], dim=2): pure input staging in the wrapper.
    x3 = jnp.concatenate([right, middle, left], axis=2).astype(jnp.float32)
    B, S, F3 = x3.shape
    H = packed['w_in'].shape[1]

    kernel = functools.partial(att_other_gaze_kernel,
                               num_layers=layer_num, num_heads=tfm_head)
    args = (x3, packed['w_in'], packed['w_qkv'], packed['w_oth'],
            packed['vecs'], packed['fin'], packed['clf'])
    vmem = pl.BlockSpec(memory_space=pltpu.MemorySpace.VMEM)
    cost = _cost_estimate(B, S, F3, H, layer_num, tfm_head, out_dim,
                          args, B * out_dim * 4)

    # Tiny problem: whole arrays resident in VMEM, single invocation (no grid).
    return pl.pallas_call(
        kernel,
        out_shape=jax.ShapeDtypeStruct((B, out_dim), jnp.float32),
        in_specs=[vmem] * len(args),
        out_specs=vmem,
        cost_estimate=cost,
    )(*args)


if __name__ == "__main__":
    # Small shapes consistent with the module
    fea_dim, hidden_dim, layer_num, tfm_head, out_dim = 16, 32, 2, 4, 3
    B, S = 2, 8

    root = jax.random.PRNGKey(0)
    k_r, k_m, k_l, k_params = jax.random.split(root, 4)

    right = jax.random.normal(k_r, (B, S, fea_dim), jnp.float32)
    middle = jax.random.normal(k_m, (B, S, fea_dim), jnp.float32)
    left = jax.random.normal(k_l, (B, S, fea_dim), jnp.float32)
    # Unused-by-forward inputs of the original signature:
    talk = candi = jnp.zeros((B, S, fea_dim), jnp.float32)

    raw = init_params(k_params, fea_dim, hidden_dim, layer_num, out_dim)
    packed = pack_params(raw, tfm_head)

    out = att_other_gaze_forward(talk, candi, right, middle, left, packed,
                                 layer_num=layer_num, tfm_head=tfm_head,
                                 out_dim=out_dim)
    out = jax.block_until_ready(out)
    assert out.shape == (B, out_dim)
    assert bool(jnp.all(jnp.isfinite(out)))
    assert bool(jnp.all((out >= 0.0) & (out <= 1.0)))  # sigmoid range
    print("KERNEL_OK")
</pallas_src>

<mosaic_0001>
module attributes {stable_mosaic.version = 11 : i64} {
  func.func @att_other_gaze_kernel(%arg0: memref<2x8x48xf32, #tpu.memory_space<vmem>>, %arg1: memref<48x32xbf16, #tpu.memory_space<vmem>>, %arg2: memref<2x32x96xbf16, #tpu.memory_space<vmem>>, %arg3: memref<2x3x32x32xbf16, #tpu.memory_space<vmem>>, %arg4: memref<2x10x32xf32, #tpu.memory_space<vmem>>, %arg5: memref<3x32xf32, #tpu.memory_space<vmem>>, %arg6: memref<33x3xf32, #tpu.memory_space<vmem>>, %arg7: memref<2x3xf32, #tpu.memory_space<vmem>>) attributes {dimension_semantics = [], scalar_prefetch = 0 : i64, scratch_operands = 0 : i64, tpu.core_type = #tpu.core_type<tc>} {
    %c0 = arith.constant 0 : index
    %c0_0 = arith.constant 0 : index
    %c0_1 = arith.constant 0 : index
    %0 = vector.load %arg0[%c0, %c0_0, %c0_1] : memref<2x8x48xf32, #tpu.memory_space<vmem>>, vector<2x8x48xf32>
    %1 = vector.shape_cast %0 : vector<2x8x48xf32> to vector<16x48xf32>
    %2 = arith.truncf %1 : vector<16x48xf32> to vector<16x48xbf16>
    %c0_2 = arith.constant 0 : index
    %c0_3 = arith.constant 0 : index
    %3 = vector.load %arg1[%c0_2, %c0_3] : memref<48x32xbf16, #tpu.memory_space<vmem>>, vector<48x32xbf16>
    %cst = arith.constant dense<0.000000e+00> : vector<16x32xf32>
    %4 = tpu.matmul %2, %3, %cst {dimension_numbers = #tpu.dot_dimension_numbers<[1], [0], [0], [1], [0, 0, 1, 1], [], []>} : vector<16x48xbf16>, vector<48x32xbf16>, vector<16x32xf32> -> vector<16x32xf32>
    %c0_4 = arith.constant 0 : index
    %c0_5 = arith.constant 0 : index
    %5 = vector.load %arg5[%c0_4, %c0_5] : memref<3x32xf32, #tpu.memory_space<vmem>>, vector<1x32xf32>
    %6 = vector.broadcast %5 : vector<1x32xf32> to vector<16x32xf32>
    %7 = arith.addf %4, %6 : vector<16x32xf32>
    %cst_6 = arith.constant 0.000000e+00 : f32
    %8 = vector.broadcast %cst_6 : f32 to vector<16x32xf32>
    %9 = arith.maximumf %7, %8 : vector<16x32xf32>
    %c0_7 = arith.constant 0 : index
    %c0_8 = arith.constant 0 : index
    %c0_9 = arith.constant 0 : index
    %10 = vector.load %arg4[%c0_7, %c0_8, %c0_9] : memref<2x10x32xf32, #tpu.memory_space<vmem>>, vector<1x10x32xf32>
    %11 = vector.shape_cast %10 : vector<1x10x32xf32> to vector<10x32xf32>
    %c0_10 = arith.constant 0 : index
    %c0_11 = arith.constant 0 : index
    %c0_12 = arith.constant 0 : index
    %c0_13 = arith.constant 0 : index
    %12 = vector.load %arg3[%c0_10, %c0_11, %c0_12, %c0_13] : memref<2x3x32x32xbf16, #tpu.memory_space<vmem>>, vector<1x3x32x32xbf16>
    %13 = vector.shape_cast %12 : vector<1x3x32x32xbf16> to vector<3x32x32xbf16>
    %14 = vector.extract_strided_slice %13 {offsets = [0, 0, 0], sizes = [1, 32, 32], strides = [1, 1, 1]} : vector<3x32x32xbf16> to vector<1x32x32xbf16>
    %15 = vector.shape_cast %14 : vector<1x32x32xbf16> to vector<32x32xbf16>
    %16 = vector.extract_strided_slice %13 {offsets = [1, 0, 0], sizes = [1, 32, 32], strides = [1, 1, 1]} : vector<3x32x32xbf16> to vector<1x32x32xbf16>
    %17 = vector.shape_cast %16 : vector<1x32x32xbf16> to vector<32x32xbf16>
    %18 = vector.extract_strided_slice %13 {offsets = [2, 0, 0], sizes = [1, 32, 32], strides = [1, 1, 1]} : vector<3x32x32xbf16> to vector<1x32x32xbf16>
    %19 = vector.shape_cast %18 : vector<1x32x32xbf16> to vector<32x32xbf16>
    %20 = arith.truncf %9 : vector<16x32xf32> to vector<16x32xbf16>
    %c0_14 = arith.constant 0 : index
    %c0_15 = arith.constant 0 : index
    %c0_16 = arith.constant 0 : index
    %21 = vector.load %arg2[%c0_14, %c0_15, %c0_16] : memref<2x32x96xbf16, #tpu.memory_space<vmem>>, vector<1x32x96xbf16>
    %22 = vector.shape_cast %21 : vector<1x32x96xbf16> to vector<32x96xbf16>
    %cst_17 = arith.constant dense<0.000000e+00> : vector<16x96xf32>
    %23 = tpu.matmul %20, %22, %cst_17 {dimension_numbers = #tpu.dot_dimension_numbers<[1], [0], [0], [1], [0, 0, 1, 1], [], []>} : vector<16x32xbf16>, vector<32x96xbf16>, vector<16x96xf32> -> vector<16x96xf32>
    %24 = vector.extract_strided_slice %23 {offsets = [0, 0], sizes = [16, 32], strides = [1, 1]} : vector<16x96xf32> to vector<16x32xf32>
    %25 = vector.extract_strided_slice %11 {offsets = [0, 0], sizes = [1, 32], strides = [1, 1]} : vector<10x32xf32> to vector<1x32xf32>
    %26 = vector.broadcast %25 : vector<1x32xf32> to vector<16x32xf32>
    %27 = arith.addf %24, %26 : vector<16x32xf32>
    %28 = vector.shape_cast %27 : vector<16x32xf32> to vector<2x8x32xf32>
    %29 = arith.truncf %28 : vector<2x8x32xf32> to vector<2x8x32xbf16>
    %30 = vector.extract_strided_slice %23 {offsets = [0, 32], sizes = [16, 32], strides = [1, 1]} : vector<16x96xf32> to vector<16x32xf32>
    %31 = vector.extract_strided_slice %11 {offsets = [1, 0], sizes = [1, 32], strides = [1, 1]} : vector<10x32xf32> to vector<1x32xf32>
    %32 = vector.broadcast %31 : vector<1x32xf32> to vector<16x32xf32>
    %33 = arith.addf %30, %32 : vector<16x32xf32>
    %34 = vector.shape_cast %33 : vector<16x32xf32> to vector<2x8x32xf32>
    %35 = arith.truncf %34 : vector<2x8x32xf32> to vector<2x8x32xbf16>
    %36 = vector.extract_strided_slice %23 {offsets = [0, 64], sizes = [16, 32], strides = [1, 1]} : vector<16x96xf32> to vector<16x32xf32>
    %37 = vector.extract_strided_slice %11 {offsets = [2, 0], sizes = [1, 32], strides = [1, 1]} : vector<10x32xf32> to vector<1x32xf32>
    %38 = vector.broadcast %37 : vector<1x32xf32> to vector<16x32xf32>
    %39 = arith.addf %36, %38 : vector<16x32xf32>
    %40 = vector.shape_cast %39 : vector<16x32xf32> to vector<2x8x32xf32>
    %41 = arith.truncf %40 : vector<2x8x32xf32> to vector<2x8x32xbf16>
    %42 = vector.extract_strided_slice %29 {offsets = [0, 0, 0], sizes = [2, 8, 8], strides = [1, 1, 1]} : vector<2x8x32xbf16> to vector<2x8x8xbf16>
    %43 = vector.extract_strided_slice %35 {offsets = [0, 0, 0], sizes = [2, 8, 8], strides = [1, 1, 1]} : vector<2x8x32xbf16> to vector<2x8x8xbf16>
    %44 = vector.extract_strided_slice %41 {offsets = [0, 0, 0], sizes = [2, 8, 8], strides = [1, 1, 1]} : vector<2x8x32xbf16> to vector<2x8x8xbf16>
    "tpu.trace_start"() <{level = 10 : i32, message = "bqd,bkd->bqk"}> : () -> ()
    %cst_18 = arith.constant dense<0.000000e+00> : vector<2x8x8xf32>
    %45 = tpu.matmul %42, %43, %cst_18 {dimension_numbers = #tpu.dot_dimension_numbers<[2], [2], [1], [1], [0, 0, 0, 1, 1, 1], [0], [0]>} : vector<2x8x8xbf16>, vector<2x8x8xbf16>, vector<2x8x8xf32> -> vector<2x8x8xf32>
    "tpu.trace_stop"() : () -> ()
    %cst_19 = arith.constant dense<0xFF800000> : vector<2x8xf32>
    %46 = vector.multi_reduction <maximumf>, %45, %cst_19 [2] : vector<2x8x8xf32> to vector<2x8xf32>
    %47 = vector.shape_cast %46 : vector<2x8xf32> to vector<2x8x1xf32>
    %48 = vector.broadcast %47 : vector<2x8x1xf32> to vector<2x8x8xf32>
    %49 = arith.subf %45, %48 : vector<2x8x8xf32>
    %50 = math.exp %49 : vector<2x8x8xf32>
    %cst_20 = arith.constant dense<0.000000e+00> : vector<2x8xf32>
    %51 = vector.multi_reduction <add>, %50, %cst_20 [2] : vector<2x8x8xf32> to vector<2x8xf32>
    %52 = vector.shape_cast %51 : vector<2x8xf32> to vector<2x8x1xf32>
    %53 = tpu.reciprocal %52 {approx = true} : vector<2x8x1xf32> -> vector<2x8x1xf32>
    %54 = vector.broadcast %53 : vector<2x8x1xf32> to vector<2x8x8xf32>
    %55 = arith.mulf %50, %54 : vector<2x8x8xf32>
    %56 = arith.truncf %55 : vector<2x8x8xf32> to vector<2x8x8xbf16>
    "tpu.trace_start"() <{level = 10 : i32, message = "bqk,bkd->bqd"}> : () -> ()
    %cst_21 = arith.constant dense<0.000000e+00> : vector<2x8x8xf32>
    %57 = tpu.matmul %56, %44, %cst_21 {dimension_numbers = #tpu.dot_dimension_numbers<[2], [1], [1], [2], [0, 0, 0, 1, 1, 2], [0], [0]>} : vector<2x8x8xbf16>, vector<2x8x8xbf16>, vector<2x8x8xf32> -> vector<2x8x8xf32>
    "tpu.trace_stop"() : () -> ()
    %58 = vector.extract_strided_slice %29 {offsets = [0, 0, 8], sizes = [2, 8, 8], strides = [1, 1, 1]} : vector<2x8x32xbf16> to vector<2x8x8xbf16>
    %59 = vector.extract_strided_slice %35 {offsets = [0, 0, 8], sizes = [2, 8, 8], strides = [1, 1, 1]} : vector<2x8x32xbf16> to vector<2x8x8xbf16>
    %60 = vector.extract_strided_slice %41 {offsets = [0, 0, 8], sizes = [2, 8, 8], strides = [1, 1, 1]} : vector<2x8x32xbf16> to vector<2x8x8xbf16>
    "tpu.trace_start"() <{level = 10 : i32, message = "bqd,bkd->bqk"}> : () -> ()
    %cst_22 = arith.constant dense<0.000000e+00> : vector<2x8x8xf32>
    %61 = tpu.matmul %58, %59, %cst_22 {dimension_numbers = #tpu.dot_dimension_numbers<[2], [2], [1], [1], [0, 0, 0, 1, 1, 1], [0], [0]>} : vector<2x8x8xbf16>, vector<2x8x8xbf16>, vector<2x8x8xf32> -> vector<2x8x8xf32>
    "tpu.trace_stop"() : () -> ()
    %cst_23 = arith.constant dense<0xFF800000> : vector<2x8xf32>
    %62 = vector.multi_reduction <maximumf>, %61, %cst_23 [2] : vector<2x8x8xf32> to vector<2x8xf32>
    %63 = vector.shape_cast %62 : vector<2x8xf32> to vector<2x8x1xf32>
    %64 = vector.broadcast %63 : vector<2x8x1xf32> to vector<2x8x8xf32>
    %65 = arith.subf %61, %64 : vector<2x8x8xf32>
    %66 = math.exp %65 : vector<2x8x8xf32>
    %cst_24 = arith.constant dense<0.000000e+00> : vector<2x8xf32>
    %67 = vector.multi_reduction <add>, %66, %cst_24 [2] : vector<2x8x8xf32> to vector<2x8xf32>
    %68 = vector.shape_cast %67 : vector<2x8xf32> to vector<2x8x1xf32>
    %69 = tpu.reciprocal %68 {approx = true} : vector<2x8x1xf32> -> vector<2x8x1xf32>
    %70 = vector.broadcast %69 : vector<2x8x1xf32> to vector<2x8x8xf32>
    %71 = arith.mulf %66, %70 : vector<2x8x8xf32>
    %72 = arith.truncf %71 : vector<2x8x8xf32> to vector<2x8x8xbf16>
    "tpu.trace_start"() <{level = 10 : i32, message = "bqk,bkd->bqd"}> : () -> ()
    %cst_25 = arith.constant dense<0.000000e+00> : vector<2x8x8xf32>
    %73 = tpu.matmul %72, %60, %cst_25 {dimension_numbers = #tpu.dot_dimension_numbers<[2], [1], [1], [2], [0, 0, 0, 1, 1, 2], [0], [0]>} : vector<2x8x8xbf16>, vector<2x8x8xbf16>, vector<2x8x8xf32> -> vector<2x8x8xf32>
    "tpu.trace_stop"() : () -> ()
    %74 = vector.extract_strided_slice %29 {offsets = [0, 0, 16], sizes = [2, 8, 8], strides = [1, 1, 1]} : vector<2x8x32xbf16> to vector<2x8x8xbf16>
    %75 = vector.extract_strided_slice %35 {offsets = [0, 0, 16], sizes = [2, 8, 8], strides = [1, 1, 1]} : vector<2x8x32xbf16> to vector<2x8x8xbf16>
    %76 = vector.extract_strided_slice %41 {offsets = [0, 0, 16], sizes = [2, 8, 8], strides = [1, 1, 1]} : vector<2x8x32xbf16> to vector<2x8x8xbf16>
    "tpu.trace_start"() <{level = 10 : i32, message = "bqd,bkd->bqk"}> : () -> ()
    %cst_26 = arith.constant dense<0.000000e+00> : vector<2x8x8xf32>
    %77 = tpu.matmul %74, %75, %cst_26 {dimension_numbers = #tpu.dot_dimension_numbers<[2], [2], [1], [1], [0, 0, 0, 1, 1, 1], [0], [0]>} : vector<2x8x8xbf16>, vector<2x8x8xbf16>, vector<2x8x8xf32> -> vector<2x8x8xf32>
    "tpu.trace_stop"() : () -> ()
    %cst_27 = arith.constant dense<0xFF800000> : vector<2x8xf32>
    %78 = vector.multi_reduction <maximumf>, %77, %cst_27 [2] : vector<2x8x8xf32> to vector<2x8xf32>
    %79 = vector.shape_cast %78 : vector<2x8xf32> to vector<2x8x1xf32>
    %80 = vector.broadcast %79 : vector<2x8x1xf32> to vector<2x8x8xf32>
    %81 = arith.subf %77, %80 : vector<2x8x8xf32>
    %82 = math.exp %81 : vector<2x8x8xf32>
    %cst_28 = arith.constant dense<0.000000e+00> : vector<2x8xf32>
    %83 = vector.multi_reduction <add>, %82, %cst_28 [2] : vector<2x8x8xf32> to vector<2x8xf32>
    %84 = vector.shape_cast %83 : vector<2x8xf32> to vector<2x8x1xf32>
    %85 = tpu.reciprocal %84 {approx = true} : vector<2x8x1xf32> -> vector<2x8x1xf32>
    %86 = vector.broadcast %85 : vector<2x8x1xf32> to vector<2x8x8xf32>
    %87 = arith.mulf %82, %86 : vector<2x8x8xf32>
    %88 = arith.truncf %87 : vector<2x8x8xf32> to vector<2x8x8xbf16>
    "tpu.trace_start"() <{level = 10 : i32, message = "bqk,bkd->bqd"}> : () -> ()
    %cst_29 = arith.constant dense<0.000000e+00> : vector<2x8x8xf32>
    %89 = tpu.matmul %88, %76, %cst_29 {dimension_numbers = #tpu.dot_dimension_numbers<[2], [1], [1], [2], [0, 0, 0, 1, 1, 2], [0], [0]>} : vector<2x8x8xbf16>, vector<2x8x8xbf16>, vector<2x8x8xf32> -> vector<2x8x8xf32>
    "tpu.trace_stop"() : () -> ()
    %90 = vector.extract_strided_slice %29 {offsets = [0, 0, 24], sizes = [2, 8, 8], strides = [1, 1, 1]} : vector<2x8x32xbf16> to vector<2x8x8xbf16>
    %91 = vector.extract_strided_slice %35 {offsets = [0, 0, 24], sizes = [2, 8, 8], strides = [1, 1, 1]} : vector<2x8x32xbf16> to vector<2x8x8xbf16>
    %92 = vector.extract_strided_slice %41 {offsets = [0, 0, 24], sizes = [2, 8, 8], strides = [1, 1, 1]} : vector<2x8x32xbf16> to vector<2x8x8xbf16>
    "tpu.trace_start"() <{level = 10 : i32, message = "bqd,bkd->bqk"}> : () -> ()
    %cst_30 = arith.constant dense<0.000000e+00> : vector<2x8x8xf32>
    %93 = tpu.matmul %90, %91, %cst_30 {dimension_numbers = #tpu.dot_dimension_numbers<[2], [2], [1], [1], [0, 0, 0, 1, 1, 1], [0], [0]>} : vector<2x8x8xbf16>, vector<2x8x8xbf16>, vector<2x8x8xf32> -> vector<2x8x8xf32>
    "tpu.trace_stop"() : () -> ()
    %cst_31 = arith.constant dense<0xFF800000> : vector<2x8xf32>
    %94 = vector.multi_reduction <maximumf>, %93, %cst_31 [2] : vector<2x8x8xf32> to vector<2x8xf32>
    %95 = vector.shape_cast %94 : vector<2x8xf32> to vector<2x8x1xf32>
    %96 = vector.broadcast %95 : vector<2x8x1xf32> to vector<2x8x8xf32>
    %97 = arith.subf %93, %96 : vector<2x8x8xf32>
    %98 = math.exp %97 : vector<2x8x8xf32>
    %cst_32 = arith.constant dense<0.000000e+00> : vector<2x8xf32>
    %99 = vector.multi_reduction <add>, %98, %cst_32 [2] : vector<2x8x8xf32> to vector<2x8xf32>
    %100 = vector.shape_cast %99 : vector<2x8xf32> to vector<2x8x1xf32>
    %101 = tpu.reciprocal %100 {approx = true} : vector<2x8x1xf32> -> vector<2x8x1xf32>
    %102 = vector.broadcast %101 : vector<2x8x1xf32> to vector<2x8x8xf32>
    %103 = arith.mulf %98, %102 : vector<2x8x8xf32>
    %104 = arith.truncf %103 : vector<2x8x8xf32> to vector<2x8x8xbf16>
    "tpu.trace_start"() <{level = 10 : i32, message = "bqk,bkd->bqd"}> : () -> ()
    %cst_33 = arith.constant dense<0.000000e+00> : vector<2x8x8xf32>
    %105 = tpu.matmul %104, %92, %cst_33 {dimension_numbers = #tpu.dot_dimension_numbers<[2], [1], [1], [2], [0, 0, 0, 1, 1, 2], [0], [0]>} : vector<2x8x8xbf16>, vector<2x8x8xbf16>, vector<2x8x8xf32> -> vector<2x8x8xf32>
    "tpu.trace_stop"() : () -> ()
    %106 = tpu.concatenate %57, %73, %89, %105 in 2 : vector<2x8x8xf32>, vector<2x8x8xf32>, vector<2x8x8xf32>, vector<2x8x8xf32> -> vector<2x8x32xf32>
    %107 = vector.shape_cast %106 : vector<2x8x32xf32> to vector<16x32xf32>
    %108 = arith.truncf %107 : vector<16x32xf32> to vector<16x32xbf16>
    %cst_34 = arith.constant dense<0.000000e+00> : vector<16x32xf32>
    %109 = tpu.matmul %108, %15, %cst_34 {dimension_numbers = #tpu.dot_dimension_numbers<[1], [0], [0], [1], [0, 0, 1, 1], [], []>} : vector<16x32xbf16>, vector<32x32xbf16>, vector<16x32xf32> -> vector<16x32xf32>
    %110 = vector.extract_strided_slice %11 {offsets = [3, 0], sizes = [1, 32], strides = [1, 1]} : vector<10x32xf32> to vector<1x32xf32>
    %111 = vector.broadcast %110 : vector<1x32xf32> to vector<16x32xf32>
    %112 = arith.addf %109, %111 : vector<16x32xf32>
    %113 = arith.addf %9, %112 : vector<16x32xf32>
    %114 = vector.extract_strided_slice %11 {offsets = [4, 0], sizes = [1, 32], strides = [1, 1]} : vector<10x32xf32> to vector<1x32xf32>
    %115 = vector.extract_strided_slice %11 {offsets = [5, 0], sizes = [1, 32], strides = [1, 1]} : vector<10x32xf32> to vector<1x32xf32>
    %cst_35 = arith.constant dense<0.000000e+00> : vector<16xf32>
    %116 = vector.multi_reduction <add>, %113, %cst_35 [1] : vector<16x32xf32> to vector<16xf32>
    %117 = vector.shape_cast %116 : vector<16xf32> to vector<16x1xf32>
    %cst_36 = arith.constant 3.200000e+01 : f32
    %118 = vector.broadcast %cst_36 : f32 to vector<16x1xf32>
    %119 = arith.divf %117, %118 : vector<16x1xf32>
    %120 = vector.broadcast %119 : vector<16x1xf32> to vector<16x32xf32>
    %121 = arith.subf %113, %120 : vector<16x32xf32>
    %122 = arith.mulf %121, %121 : vector<16x32xf32>
    %cst_37 = arith.constant dense<0.000000e+00> : vector<16xf32>
    %123 = vector.multi_reduction <add>, %122, %cst_37 [1] : vector<16x32xf32> to vector<16xf32>
    %124 = vector.shape_cast %123 : vector<16xf32> to vector<16x1xf32>
    %cst_38 = arith.constant 3.200000e+01 : f32
    %125 = vector.broadcast %cst_38 : f32 to vector<16x1xf32>
    %126 = arith.divf %124, %125 : vector<16x1xf32>
    %127 = vector.broadcast %119 : vector<16x1xf32> to vector<16x32xf32>
    %128 = arith.subf %113, %127 : vector<16x32xf32>
    %cst_39 = arith.constant 9.99999974E-6 : f32
    %129 = vector.broadcast %cst_39 : f32 to vector<16x1xf32>
    %130 = arith.addf %126, %129 : vector<16x1xf32>
    %131 = math.rsqrt %130 : vector<16x1xf32>
    %132 = vector.broadcast %131 : vector<16x1xf32> to vector<16x32xf32>
    %133 = arith.mulf %128, %132 : vector<16x32xf32>
    %134 = vector.broadcast %114 : vector<1x32xf32> to vector<16x32xf32>
    %135 = arith.mulf %133, %134 : vector<16x32xf32>
    %136 = vector.broadcast %115 : vector<1x32xf32> to vector<16x32xf32>
    %137 = arith.addf %135, %136 : vector<16x32xf32>
    %138 = arith.truncf %137 : vector<16x32xf32> to vector<16x32xbf16>
    %cst_40 = arith.constant dense<0.000000e+00> : vector<16x32xf32>
    %139 = tpu.matmul %138, %17, %cst_40 {dimension_numbers = #tpu.dot_dimension_numbers<[1], [0], [0], [1], [0, 0, 1, 1], [], []>} : vector<16x32xbf16>, vector<32x32xbf16>, vector<16x32xf32> -> vector<16x32xf32>
    %140 = vector.extract_strided_slice %11 {offsets = [6, 0], sizes = [1, 32], strides = [1, 1]} : vector<10x32xf32> to vector<1x32xf32>
    %141 = vector.broadcast %140 : vector<1x32xf32> to vector<16x32xf32>
    %142 = arith.addf %139, %141 : vector<16x32xf32>
    %cst_41 = arith.constant 5.000000e-01 : f32
    %143 = vector.broadcast %cst_41 : f32 to vector<16x32xf32>
    %144 = arith.mulf %143, %142 : vector<16x32xf32>
    %cst_42 = arith.constant 0.707106769 : f32
    %145 = vector.broadcast %cst_42 : f32 to vector<16x32xf32>
    %146 = arith.mulf %142, %145 : vector<16x32xf32>
    %147 = math.erf %146 : vector<16x32xf32>
    %cst_43 = arith.constant 1.000000e+00 : f32
    %148 = vector.broadcast %cst_43 : f32 to vector<16x32xf32>
    %149 = arith.addf %148, %147 : vector<16x32xf32>
    %150 = arith.mulf %144, %149 : vector<16x32xf32>
    %151 = arith.truncf %150 : vector<16x32xf32> to vector<16x32xbf16>
    %cst_44 = arith.constant dense<0.000000e+00> : vector<16x32xf32>
    %152 = tpu.matmul %151, %19, %cst_44 {dimension_numbers = #tpu.dot_dimension_numbers<[1], [0], [0], [1], [0, 0, 1, 1], [], []>} : vector<16x32xbf16>, vector<32x32xbf16>, vector<16x32xf32> -> vector<16x32xf32>
    %153 = vector.extract_strided_slice %11 {offsets = [7, 0], sizes = [1, 32], strides = [1, 1]} : vector<10x32xf32> to vector<1x32xf32>
    %154 = vector.broadcast %153 : vector<1x32xf32> to vector<16x32xf32>
    %155 = arith.addf %152, %154 : vector<16x32xf32>
    %156 = arith.addf %137, %155 : vector<16x32xf32>
    %157 = vector.extract_strided_slice %11 {offsets = [8, 0], sizes = [1, 32], strides = [1, 1]} : vector<10x32xf32> to vector<1x32xf32>
    %158 = vector.extract_strided_slice %11 {offsets = [9, 0], sizes = [1, 32], strides = [1, 1]} : vector<10x32xf32> to vector<1x32xf32>
    %cst_45 = arith.constant dense<0.000000e+00> : vector<16xf32>
    %159 = vector.multi_reduction <add>, %156, %cst_45 [1] : vector<16x32xf32> to vector<16xf32>
    %160 = vector.shape_cast %159 : vector<16xf32> to vector<16x1xf32>
    %cst_46 = arith.constant 3.200000e+01 : f32
    %161 = vector.broadcast %cst_46 : f32 to vector<16x1xf32>
    %162 = arith.divf %160, %161 : vector<16x1xf32>
    %163 = vector.broadcast %162 : vector<16x1xf32> to vector<16x32xf32>
    %164 = arith.subf %156, %163 : vector<16x32xf32>
    %165 = arith.mulf %164, %164 : vector<16x32xf32>
    %cst_47 = arith.constant dense<0.000000e+00> : vector<16xf32>
    %166 = vector.multi_reduction <add>, %165, %cst_47 [1] : vector<16x32xf32> to vector<16xf32>
    %167 = vector.shape_cast %166 : vector<16xf32> to vector<16x1xf32>
    %cst_48 = arith.constant 3.200000e+01 : f32
    %168 = vector.broadcast %cst_48 : f32 to vector<16x1xf32>
    %169 = arith.divf %167, %168 : vector<16x1xf32>
    %170 = vector.broadcast %162 : vector<16x1xf32> to vector<16x32xf32>
    %171 = arith.subf %156, %170 : vector<16x32xf32>
    %cst_49 = arith.constant 9.99999974E-6 : f32
    %172 = vector.broadcast %cst_49 : f32 to vector<16x1xf32>
    %173 = arith.addf %169, %172 : vector<16x1xf32>
    %174 = math.rsqrt %173 : vector<16x1xf32>
    %175 = vector.broadcast %174 : vector<16x1xf32> to vector<16x32xf32>
    %176 = arith.mulf %171, %175 : vector<16x32xf32>
    %177 = vector.broadcast %157 : vector<1x32xf32> to vector<16x32xf32>
    %178 = arith.mulf %176, %177 : vector<16x32xf32>
    %179 = vector.broadcast %158 : vector<1x32xf32> to vector<16x32xf32>
    %180 = arith.addf %178, %179 : vector<16x32xf32>
    %c1 = arith.constant 1 : index
    %c0_50 = arith.constant 0 : index
    %c0_51 = arith.constant 0 : index
    %181 = vector.load %arg4[%c1, %c0_50, %c0_51] : memref<2x10x32xf32, #tpu.memory_space<vmem>>, vector<1x10x32xf32>
    %182 = vector.shape_cast %181 : vector<1x10x32xf32> to vector<10x32xf32>
    %c1_52 = arith.constant 1 : index
    %c0_53 = arith.constant 0 : index
    %c0_54 = arith.constant 0 : index
    %c0_55 = arith.constant 0 : index
    %183 = vector.load %arg3[%c1_52, %c0_53, %c0_54, %c0_55] : memref<2x3x32x32xbf16, #tpu.memory_space<vmem>>, vector<1x3x32x32xbf16>
    %184 = vector.shape_cast %183 : vector<1x3x32x32xbf16> to vector<3x32x32xbf16>
    %185 = vector.extract_strided_slice %184 {offsets = [0, 0, 0], sizes = [1, 32, 32], strides = [1, 1, 1]} : vector<3x32x32xbf16> to vector<1x32x32xbf16>
    %186 = vector.shape_cast %185 : vector<1x32x32xbf16> to vector<32x32xbf16>
    %187 = vector.extract_strided_slice %184 {offsets = [1, 0, 0], sizes = [1, 32, 32], strides = [1, 1, 1]} : vector<3x32x32xbf16> to vector<1x32x32xbf16>
    %188 = vector.shape_cast %187 : vector<1x32x32xbf16> to vector<32x32xbf16>
    %189 = vector.extract_strided_slice %184 {offsets = [2, 0, 0], sizes = [1, 32, 32], strides = [1, 1, 1]} : vector<3x32x32xbf16> to vector<1x32x32xbf16>
    %190 = vector.shape_cast %189 : vector<1x32x32xbf16> to vector<32x32xbf16>
    %191 = arith.truncf %180 : vector<16x32xf32> to vector<16x32xbf16>
    %c1_56 = arith.constant 1 : index
    %c0_57 = arith.constant 0 : index
    %c0_58 = arith.constant 0 : index
    %192 = vector.load %arg2[%c1_56, %c0_57, %c0_58] : memref<2x32x96xbf16, #tpu.memory_space<vmem>>, vector<1x32x96xbf16>
    %193 = vector.shape_cast %192 : vector<1x32x96xbf16> to vector<32x96xbf16>
    %cst_59 = arith.constant dense<0.000000e+00> : vector<16x96xf32>
    %194 = tpu.matmul %191, %193, %cst_59 {dimension_numbers = #tpu.dot_dimension_numbers<[1], [0], [0], [1], [0, 0, 1, 1], [], []>} : vector<16x32xbf16>, vector<32x96xbf16>, vector<16x96xf32> -> vector<16x96xf32>
    %195 = vector.extract_strided_slice %194 {offsets = [0, 0], sizes = [16, 32], strides = [1, 1]} : vector<16x96xf32> to vector<16x32xf32>
    %196 = vector.extract_strided_slice %182 {offsets = [0, 0], sizes = [1, 32], strides = [1, 1]} : vector<10x32xf32> to vector<1x32xf32>
    %197 = vector.broadcast %196 : vector<1x32xf32> to vector<16x32xf32>
    %198 = arith.addf %195, %197 : vector<16x32xf32>
    %199 = vector.shape_cast %198 : vector<16x32xf32> to vector<2x8x32xf32>
    %200 = arith.truncf %199 : vector<2x8x32xf32> to vector<2x8x32xbf16>
    %201 = vector.extract_strided_slice %194 {offsets = [0, 32], sizes = [16, 32], strides = [1, 1]} : vector<16x96xf32> to vector<16x32xf32>
    %202 = vector.extract_strided_slice %182 {offsets = [1, 0], sizes = [1, 32], strides = [1, 1]} : vector<10x32xf32> to vector<1x32xf32>
    %203 = vector.broadcast %202 : vector<1x32xf32> to vector<16x32xf32>
    %204 = arith.addf %201, %203 : vector<16x32xf32>
    %205 = vector.shape_cast %204 : vector<16x32xf32> to vector<2x8x32xf32>
    %206 = arith.truncf %205 : vector<2x8x32xf32> to vector<2x8x32xbf16>
    %207 = vector.extract_strided_slice %194 {offsets = [0, 64], sizes = [16, 32], strides = [1, 1]} : vector<16x96xf32> to vector<16x32xf32>
    %208 = vector.extract_strided_slice %182 {offsets = [2, 0], sizes = [1, 32], strides = [1, 1]} : vector<10x32xf32> to vector<1x32xf32>
    %209 = vector.broadcast %208 : vector<1x32xf32> to vector<16x32xf32>
    %210 = arith.addf %207, %209 : vector<16x32xf32>
    %211 = vector.shape_cast %210 : vector<16x32xf32> to vector<2x8x32xf32>
    %212 = arith.truncf %211 : vector<2x8x32xf32> to vector<2x8x32xbf16>
    %213 = vector.extract_strided_slice %200 {offsets = [0, 0, 0], sizes = [2, 8, 8], strides = [1, 1, 1]} : vector<2x8x32xbf16> to vector<2x8x8xbf16>
    %214 = vector.extract_strided_slice %206 {offsets = [0, 0, 0], sizes = [2, 8, 8], strides = [1, 1, 1]} : vector<2x8x32xbf16> to vector<2x8x8xbf16>
    %215 = vector.extract_strided_slice %212 {offsets = [0, 0, 0], sizes = [2, 8, 8], strides = [1, 1, 1]} : vector<2x8x32xbf16> to vector<2x8x8xbf16>
    "tpu.trace_start"() <{level = 10 : i32, message = "bqd,bkd->bqk"}> : () -> ()
    %cst_60 = arith.constant dense<0.000000e+00> : vector<2x8x8xf32>
    %216 = tpu.matmul %213, %214, %cst_60 {dimension_numbers = #tpu.dot_dimension_numbers<[2], [2], [1], [1], [0, 0, 0, 1, 1, 1], [0], [0]>} : vector<2x8x8xbf16>, vector<2x8x8xbf16>, vector<2x8x8xf32> -> vector<2x8x8xf32>
    "tpu.trace_stop"() : () -> ()
    %cst_61 = arith.constant dense<0xFF800000> : vector<2x8xf32>
    %217 = vector.multi_reduction <maximumf>, %216, %cst_61 [2] : vector<2x8x8xf32> to vector<2x8xf32>
    %218 = vector.shape_cast %217 : vector<2x8xf32> to vector<2x8x1xf32>
    %219 = vector.broadcast %218 : vector<2x8x1xf32> to vector<2x8x8xf32>
    %220 = arith.subf %216, %219 : vector<2x8x8xf32>
    %221 = math.exp %220 : vector<2x8x8xf32>
    %cst_62 = arith.constant dense<0.000000e+00> : vector<2x8xf32>
    %222 = vector.multi_reduction <add>, %221, %cst_62 [2] : vector<2x8x8xf32> to vector<2x8xf32>
    %223 = vector.shape_cast %222 : vector<2x8xf32> to vector<2x8x1xf32>
    %224 = tpu.reciprocal %223 {approx = true} : vector<2x8x1xf32> -> vector<2x8x1xf32>
    %225 = vector.broadcast %224 : vector<2x8x1xf32> to vector<2x8x8xf32>
    %226 = arith.mulf %221, %225 : vector<2x8x8xf32>
    %227 = arith.truncf %226 : vector<2x8x8xf32> to vector<2x8x8xbf16>
    "tpu.trace_start"() <{level = 10 : i32, message = "bqk,bkd->bqd"}> : () -> ()
    %cst_63 = arith.constant dense<0.000000e+00> : vector<2x8x8xf32>
    %228 = tpu.matmul %227, %215, %cst_63 {dimension_numbers = #tpu.dot_dimension_numbers<[2], [1], [1], [2], [0, 0, 0, 1, 1, 2], [0], [0]>} : vector<2x8x8xbf16>, vector<2x8x8xbf16>, vector<2x8x8xf32> -> vector<2x8x8xf32>
    "tpu.trace_stop"() : () -> ()
    %229 = vector.extract_strided_slice %200 {offsets = [0, 0, 8], sizes = [2, 8, 8], strides = [1, 1, 1]} : vector<2x8x32xbf16> to vector<2x8x8xbf16>
    %230 = vector.extract_strided_slice %206 {offsets = [0, 0, 8], sizes = [2, 8, 8], strides = [1, 1, 1]} : vector<2x8x32xbf16> to vector<2x8x8xbf16>
    %231 = vector.extract_strided_slice %212 {offsets = [0, 0, 8], sizes = [2, 8, 8], strides = [1, 1, 1]} : vector<2x8x32xbf16> to vector<2x8x8xbf16>
    "tpu.trace_start"() <{level = 10 : i32, message = "bqd,bkd->bqk"}> : () -> ()
    %cst_64 = arith.constant dense<0.000000e+00> : vector<2x8x8xf32>
    %232 = tpu.matmul %229, %230, %cst_64 {dimension_numbers = #tpu.dot_dimension_numbers<[2], [2], [1], [1], [0, 0, 0, 1, 1, 1], [0], [0]>} : vector<2x8x8xbf16>, vector<2x8x8xbf16>, vector<2x8x8xf32> -> vector<2x8x8xf32>
    "tpu.trace_stop"() : () -> ()
    %cst_65 = arith.constant dense<0xFF800000> : vector<2x8xf32>
    %233 = vector.multi_reduction <maximumf>, %232, %cst_65 [2] : vector<2x8x8xf32> to vector<2x8xf32>
    %234 = vector.shape_cast %233 : vector<2x8xf32> to vector<2x8x1xf32>
    %235 = vector.broadcast %234 : vector<2x8x1xf32> to vector<2x8x8xf32>
    %236 = arith.subf %232, %235 : vector<2x8x8xf32>
    %237 = math.exp %236 : vector<2x8x8xf32>
    %cst_66 = arith.constant dense<0.000000e+00> : vector<2x8xf32>
    %238 = vector.multi_reduction <add>, %237, %cst_66 [2] : vector<2x8x8xf32> to vector<2x8xf32>
    %239 = vector.shape_cast %238 : vector<2x8xf32> to vector<2x8x1xf32>
    %240 = tpu.reciprocal %239 {approx = true} : vector<2x8x1xf32> -> vector<2x8x1xf32>
    %241 = vector.broadcast %240 : vector<2x8x1xf32> to vector<2x8x8xf32>
    %242 = arith.mulf %237, %241 : vector<2x8x8xf32>
    %243 = arith.truncf %242 : vector<2x8x8xf32> to vector<2x8x8xbf16>
    "tpu.trace_start"() <{level = 10 : i32, message = "bqk,bkd->bqd"}> : () -> ()
    %cst_67 = arith.constant dense<0.000000e+00> : vector<2x8x8xf32>
    %244 = tpu.matmul %243, %231, %cst_67 {dimension_numbers = #tpu.dot_dimension_numbers<[2], [1], [1], [2], [0, 0, 0, 1, 1, 2], [0], [0]>} : vector<2x8x8xbf16>, vector<2x8x8xbf16>, vector<2x8x8xf32> -> vector<2x8x8xf32>
    "tpu.trace_stop"() : () -> ()
    %245 = vector.extract_strided_slice %200 {offsets = [0, 0, 16], sizes = [2, 8, 8], strides = [1, 1, 1]} : vector<2x8x32xbf16> to vector<2x8x8xbf16>
    %246 = vector.extract_strided_slice %206 {offsets = [0, 0, 16], sizes = [2, 8, 8], strides = [1, 1, 1]} : vector<2x8x32xbf16> to vector<2x8x8xbf16>
    %247 = vector.extract_strided_slice %212 {offsets = [0, 0, 16], sizes = [2, 8, 8], strides = [1, 1, 1]} : vector<2x8x32xbf16> to vector<2x8x8xbf16>
    "tpu.trace_start"() <{level = 10 : i32, message = "bqd,bkd->bqk"}> : () -> ()
    %cst_68 = arith.constant dense<0.000000e+00> : vector<2x8x8xf32>
    %248 = tpu.matmul %245, %246, %cst_68 {dimension_numbers = #tpu.dot_dimension_numbers<[2], [2], [1], [1], [0, 0, 0, 1, 1, 1], [0], [0]>} : vector<2x8x8xbf16>, vector<2x8x8xbf16>, vector<2x8x8xf32> -> vector<2x8x8xf32>
    "tpu.trace_stop"() : () -> ()
    %cst_69 = arith.constant dense<0xFF800000> : vector<2x8xf32>
    %249 = vector.multi_reduction <maximumf>, %248, %cst_69 [2] : vector<2x8x8xf32> to vector<2x8xf32>
    %250 = vector.shape_cast %249 : vector<2x8xf32> to vector<2x8x1xf32>
    %251 = vector.broadcast %250 : vector<2x8x1xf32> to vector<2x8x8xf32>
    %252 = arith.subf %248, %251 : vector<2x8x8xf32>
    %253 = math.exp %252 : vector<2x8x8xf32>
    %cst_70 = arith.constant dense<0.000000e+00> : vector<2x8xf32>
    %254 = vector.multi_reduction <add>, %253, %cst_70 [2] : vector<2x8x8xf32> to vector<2x8xf32>
    %255 = vector.shape_cast %254 : vector<2x8xf32> to vector<2x8x1xf32>
    %256 = tpu.reciprocal %255 {approx = true} : vector<2x8x1xf32> -> vector<2x8x1xf32>
    %257 = vector.broadcast %256 : vector<2x8x1xf32> to vector<2x8x8xf32>
    %258 = arith.mulf %253, %257 : vector<2x8x8xf32>
    %259 = arith.truncf %258 : vector<2x8x8xf32> to vector<2x8x8xbf16>
    "tpu.trace_start"() <{level = 10 : i32, message = "bqk,bkd->bqd"}> : () -> ()
    %cst_71 = arith.constant dense<0.000000e+00> : vector<2x8x8xf32>
    %260 = tpu.matmul %259, %247, %cst_71 {dimension_numbers = #tpu.dot_dimension_numbers<[2], [1], [1], [2], [0, 0, 0, 1, 1, 2], [0], [0]>} : vector<2x8x8xbf16>, vector<2x8x8xbf16>, vector<2x8x8xf32> -> vector<2x8x8xf32>
    "tpu.trace_stop"() : () -> ()
    %261 = vector.extract_strided_slice %200 {offsets = [0, 0, 24], sizes = [2, 8, 8], strides = [1, 1, 1]} : vector<2x8x32xbf16> to vector<2x8x8xbf16>
    %262 = vector.extract_strided_slice %206 {offsets = [0, 0, 24], sizes = [2, 8, 8], strides = [1, 1, 1]} : vector<2x8x32xbf16> to vector<2x8x8xbf16>
    %263 = vector.extract_strided_slice %212 {offsets = [0, 0, 24], sizes = [2, 8, 8], strides = [1, 1, 1]} : vector<2x8x32xbf16> to vector<2x8x8xbf16>
    "tpu.trace_start"() <{level = 10 : i32, message = "bqd,bkd->bqk"}> : () -> ()
    %cst_72 = arith.constant dense<0.000000e+00> : vector<2x8x8xf32>
    %264 = tpu.matmul %261, %262, %cst_72 {dimension_numbers = #tpu.dot_dimension_numbers<[2], [2], [1], [1], [0, 0, 0, 1, 1, 1], [0], [0]>} : vector<2x8x8xbf16>, vector<2x8x8xbf16>, vector<2x8x8xf32> -> vector<2x8x8xf32>
    "tpu.trace_stop"() : () -> ()
    %cst_73 = arith.constant dense<0xFF800000> : vector<2x8xf32>
    %265 = vector.multi_reduction <maximumf>, %264, %cst_73 [2] : vector<2x8x8xf32> to vector<2x8xf32>
    %266 = vector.shape_cast %265 : vector<2x8xf32> to vector<2x8x1xf32>
    %267 = vector.broadcast %266 : vector<2x8x1xf32> to vector<2x8x8xf32>
    %268 = arith.subf %264, %267 : vector<2x8x8xf32>
    %269 = math.exp %268 : vector<2x8x8xf32>
    %cst_74 = arith.constant dense<0.000000e+00> : vector<2x8xf32>
    %270 = vector.multi_reduction <add>, %269, %cst_74 [2] : vector<2x8x8xf32> to vector<2x8xf32>
    %271 = vector.shape_cast %270 : vector<2x8xf32> to vector<2x8x1xf32>
    %272 = tpu.reciprocal %271 {approx = true} : vector<2x8x1xf32> -> vector<2x8x1xf32>
    %273 = vector.broadcast %272 : vector<2x8x1xf32> to vector<2x8x8xf32>
    %274 = arith.mulf %269, %273 : vector<2x8x8xf32>
    %275 = arith.truncf %274 : vector<2x8x8xf32> to vector<2x8x8xbf16>
    "tpu.trace_start"() <{level = 10 : i32, message = "bqk,bkd->bqd"}> : () -> ()
    %cst_75 = arith.constant dense<0.000000e+00> : vector<2x8x8xf32>
    %276 = tpu.matmul %275, %263, %cst_75 {dimension_numbers = #tpu.dot_dimension_numbers<[2], [1], [1], [2], [0, 0, 0, 1, 1, 2], [0], [0]>} : vector<2x8x8xbf16>, vector<2x8x8xbf16>, vector<2x8x8xf32> -> vector<2x8x8xf32>
    "tpu.trace_stop"() : () -> ()
    %277 = tpu.concatenate %228, %244, %260, %276 in 2 : vector<2x8x8xf32>, vector<2x8x8xf32>, vector<2x8x8xf32>, vector<2x8x8xf32> -> vector<2x8x32xf32>
    %278 = vector.shape_cast %277 : vector<2x8x32xf32> to vector<16x32xf32>
    %279 = arith.truncf %278 : vector<16x32xf32> to vector<16x32xbf16>
    %cst_76 = arith.constant dense<0.000000e+00> : vector<16x32xf32>
    %280 = tpu.matmul %279, %186, %cst_76 {dimension_numbers = #tpu.dot_dimension_numbers<[1], [0], [0], [1], [0, 0, 1, 1], [], []>} : vector<16x32xbf16>, vector<32x32xbf16>, vector<16x32xf32> -> vector<16x32xf32>
    %281 = vector.extract_strided_slice %182 {offsets = [3, 0], sizes = [1, 32], strides = [1, 1]} : vector<10x32xf32> to vector<1x32xf32>
    %282 = vector.broadcast %281 : vector<1x32xf32> to vector<16x32xf32>
    %283 = arith.addf %280, %282 : vector<16x32xf32>
    %284 = arith.addf %180, %283 : vector<16x32xf32>
    %285 = vector.extract_strided_slice %182 {offsets = [4, 0], sizes = [1, 32], strides = [1, 1]} : vector<10x32xf32> to vector<1x32xf32>
    %286 = vector.extract_strided_slice %182 {offsets = [5, 0], sizes = [1, 32], strides = [1, 1]} : vector<10x32xf32> to vector<1x32xf32>
    %cst_77 = arith.constant dense<0.000000e+00> : vector<16xf32>
    %287 = vector.multi_reduction <add>, %284, %cst_77 [1] : vector<16x32xf32> to vector<16xf32>
    %288 = vector.shape_cast %287 : vector<16xf32> to vector<16x1xf32>
    %cst_78 = arith.constant 3.200000e+01 : f32
    %289 = vector.broadcast %cst_78 : f32 to vector<16x1xf32>
    %290 = arith.divf %288, %289 : vector<16x1xf32>
    %291 = vector.broadcast %290 : vector<16x1xf32> to vector<16x32xf32>
    %292 = arith.subf %284, %291 : vector<16x32xf32>
    %293 = arith.mulf %292, %292 : vector<16x32xf32>
    %cst_79 = arith.constant dense<0.000000e+00> : vector<16xf32>
    %294 = vector.multi_reduction <add>, %293, %cst_79 [1] : vector<16x32xf32> to vector<16xf32>
    %295 = vector.shape_cast %294 : vector<16xf32> to vector<16x1xf32>
    %cst_80 = arith.constant 3.200000e+01 : f32
    %296 = vector.broadcast %cst_80 : f32 to vector<16x1xf32>
    %297 = arith.divf %295, %296 : vector<16x1xf32>
    %298 = vector.broadcast %290 : vector<16x1xf32> to vector<16x32xf32>
    %299 = arith.subf %284, %298 : vector<16x32xf32>
    %cst_81 = arith.constant 9.99999974E-6 : f32
    %300 = vector.broadcast %cst_81 : f32 to vector<16x1xf32>
    %301 = arith.addf %297, %300 : vector<16x1xf32>
    %302 = math.rsqrt %301 : vector<16x1xf32>
    %303 = vector.broadcast %302 : vector<16x1xf32> to vector<16x32xf32>
    %304 = arith.mulf %299, %303 : vector<16x32xf32>
    %305 = vector.broadcast %285 : vector<1x32xf32> to vector<16x32xf32>
    %306 = arith.mulf %304, %305 : vector<16x32xf32>
    %307 = vector.broadcast %286 : vector<1x32xf32> to vector<16x32xf32>
    %308 = arith.addf %306, %307 : vector<16x32xf32>
    %309 = arith.truncf %308 : vector<16x32xf32> to vector<16x32xbf16>
    %cst_82 = arith.constant dense<0.000000e+00> : vector<16x32xf32>
    %310 = tpu.matmul %309, %188, %cst_82 {dimension_numbers = #tpu.dot_dimension_numbers<[1], [0], [0], [1], [0, 0, 1, 1], [], []>} : vector<16x32xbf16>, vector<32x32xbf16>, vector<16x32xf32> -> vector<16x32xf32>
    %311 = vector.extract_strided_slice %182 {offsets = [6, 0], sizes = [1, 32], strides = [1, 1]} : vector<10x32xf32> to vector<1x32xf32>
    %312 = vector.broadcast %311 : vector<1x32xf32> to vector<16x32xf32>
    %313 = arith.addf %310, %312 : vector<16x32xf32>
    %cst_83 = arith.constant 5.000000e-01 : f32
    %314 = vector.broadcast %cst_83 : f32 to vector<16x32xf32>
    %315 = arith.mulf %314, %313 : vector<16x32xf32>
    %cst_84 = arith.constant 0.707106769 : f32
    %316 = vector.broadcast %cst_84 : f32 to vector<16x32xf32>
    %317 = arith.mulf %313, %316 : vector<16x32xf32>
    %318 = math.erf %317 : vector<16x32xf32>
    %cst_85 = arith.constant 1.000000e+00 : f32
    %319 = vector.broadcast %cst_85 : f32 to vector<16x32xf32>
    %320 = arith.addf %319, %318 : vector<16x32xf32>
    %321 = arith.mulf %315, %320 : vector<16x32xf32>
    %322 = arith.truncf %321 : vector<16x32xf32> to vector<16x32xbf16>
    %cst_86 = arith.constant dense<0.000000e+00> : vector<16x32xf32>
    %323 = tpu.matmul %322, %190, %cst_86 {dimension_numbers = #tpu.dot_dimension_numbers<[1], [0], [0], [1], [0, 0, 1, 1], [], []>} : vector<16x32xbf16>, vector<32x32xbf16>, vector<16x32xf32> -> vector<16x32xf32>
    %324 = vector.extract_strided_slice %182 {offsets = [7, 0], sizes = [1, 32], strides = [1, 1]} : vector<10x32xf32> to vector<1x32xf32>
    %325 = vector.broadcast %324 : vector<1x32xf32> to vector<16x32xf32>
    %326 = arith.addf %323, %325 : vector<16x32xf32>
    %327 = arith.addf %308, %326 : vector<16x32xf32>
    %328 = vector.extract_strided_slice %182 {offsets = [8, 0], sizes = [1, 32], strides = [1, 1]} : vector<10x32xf32> to vector<1x32xf32>
    %329 = vector.extract_strided_slice %182 {offsets = [9, 0], sizes = [1, 32], strides = [1, 1]} : vector<10x32xf32> to vector<1x32xf32>
    %cst_87 = arith.constant dense<0.000000e+00> : vector<16xf32>
    %330 = vector.multi_reduction <add>, %327, %cst_87 [1] : vector<16x32xf32> to vector<16xf32>
    %331 = vector.shape_cast %330 : vector<16xf32> to vector<16x1xf32>
    %cst_88 = arith.constant 3.200000e+01 : f32
    %332 = vector.broadcast %cst_88 : f32 to vector<16x1xf32>
    %333 = arith.divf %331, %332 : vector<16x1xf32>
    %334 = vector.broadcast %333 : vector<16x1xf32> to vector<16x32xf32>
    %335 = arith.subf %327, %334 : vector<16x32xf32>
    %336 = arith.mulf %335, %335 : vector<16x32xf32>
    %cst_89 = arith.constant dense<0.000000e+00> : vector<16xf32>
    %337 = vector.multi_reduction <add>, %336, %cst_89 [1] : vector<16x32xf32> to vector<16xf32>
    %338 = vector.shape_cast %337 : vector<16xf32> to vector<16x1xf32>
    %cst_90 = arith.constant 3.200000e+01 : f32
    %339 = vector.broadcast %cst_90 : f32 to vector<16x1xf32>
    %340 = arith.divf %338, %339 : vector<16x1xf32>
    %341 = vector.broadcast %333 : vector<16x1xf32> to vector<16x32xf32>
    %342 = arith.subf %327, %341 : vector<16x32xf32>
    %cst_91 = arith.constant 9.99999974E-6 : f32
    %343 = vector.broadcast %cst_91 : f32 to vector<16x1xf32>
    %344 = arith.addf %340, %343 : vector<16x1xf32>
    %345 = math.rsqrt %344 : vector<16x1xf32>
    %346 = vector.broadcast %345 : vector<16x1xf32> to vector<16x32xf32>
    %347 = arith.mulf %342, %346 : vector<16x32xf32>
    %348 = vector.broadcast %328 : vector<1x32xf32> to vector<16x32xf32>
    %349 = arith.mulf %347, %348 : vector<16x32xf32>
    %350 = vector.broadcast %329 : vector<1x32xf32> to vector<16x32xf32>
    %351 = arith.addf %349, %350 : vector<16x32xf32>
    %c1_92 = arith.constant 1 : index
    %c0_93 = arith.constant 0 : index
    %352 = vector.load %arg5[%c1_92, %c0_93] : memref<3x32xf32, #tpu.memory_space<vmem>>, vector<1x32xf32>
    %c2 = arith.constant 2 : index
    %c0_94 = arith.constant 0 : index
    %353 = vector.load %arg5[%c2, %c0_94] : memref<3x32xf32, #tpu.memory_space<vmem>>, vector<1x32xf32>
    %cst_95 = arith.constant dense<0.000000e+00> : vector<16xf32>
    %354 = vector.multi_reduction <add>, %351, %cst_95 [1] : vector<16x32xf32> to vector<16xf32>
    %355 = vector.shape_cast %354 : vector<16xf32> to vector<16x1xf32>
    %cst_96 = arith.constant 3.200000e+01 : f32
    %356 = vector.broadcast %cst_96 : f32 to vector<16x1xf32>
    %357 = arith.divf %355, %356 : vector<16x1xf32>
    %358 = vector.broadcast %357 : vector<16x1xf32> to vector<16x32xf32>
    %359 = arith.subf %351, %358 : vector<16x32xf32>
    %360 = arith.mulf %359, %359 : vector<16x32xf32>
    %cst_97 = arith.constant dense<0.000000e+00> : vector<16xf32>
    %361 = vector.multi_reduction <add>, %360, %cst_97 [1] : vector<16x32xf32> to vector<16xf32>
    %362 = vector.shape_cast %361 : vector<16xf32> to vector<16x1xf32>
    %cst_98 = arith.constant 3.200000e+01 : f32
    %363 = vector.broadcast %cst_98 : f32 to vector<16x1xf32>
    %364 = arith.divf %362, %363 : vector<16x1xf32>
    %365 = vector.broadcast %357 : vector<16x1xf32> to vector<16x32xf32>
    %366 = arith.subf %351, %365 : vector<16x32xf32>
    %cst_99 = arith.constant 9.99999974E-6 : f32
    %367 = vector.broadcast %cst_99 : f32 to vector<16x1xf32>
    %368 = arith.addf %364, %367 : vector<16x1xf32>
    %369 = math.rsqrt %368 : vector<16x1xf32>
    %370 = vector.broadcast %369 : vector<16x1xf32> to vector<16x32xf32>
    %371 = arith.mulf %366, %370 : vector<16x32xf32>
    %372 = vector.broadcast %352 : vector<1x32xf32> to vector<16x32xf32>
    %373 = arith.mulf %371, %372 : vector<16x32xf32>
    %374 = vector.broadcast %353 : vector<1x32xf32> to vector<16x32xf32>
    %375 = arith.addf %373, %374 : vector<16x32xf32>
    %376 = vector.shape_cast %375 : vector<16x32xf32> to vector<2x8x32xf32>
    %cst_100 = arith.constant dense<0.000000e+00> : vector<2x32xf32>
    %377 = vector.multi_reduction <add>, %376, %cst_100 [1] : vector<2x8x32xf32> to vector<2x32xf32>
    %cst_101 = arith.constant 8.000000e+00 : f32
    %378 = vector.broadcast %cst_101 : f32 to vector<2x32xf32>
    %379 = arith.divf %377, %378 : vector<2x32xf32>
    %c0_102 = arith.constant 0 : index
    %c0_103 = arith.constant 0 : index
    %380 = vector.load %arg6[%c0_102, %c0_103] : memref<33x3xf32, #tpu.memory_space<vmem>>, vector<33x3xf32>
    %381 = vector.extract_strided_slice %380 {offsets = [0, 0], sizes = [32, 3], strides = [1, 1]} : vector<33x3xf32> to vector<32x3xf32>
    %cst_104 = arith.constant dense<0.000000e+00> : vector<2x3xf32>
    %382 = tpu.matmul %379, %381, %cst_104 {dimension_numbers = #tpu.dot_dimension_numbers<[1], [0], [0], [1], [0, 0, 1, 1], [], []>} : vector<2x32xf32>, vector<32x3xf32>, vector<2x3xf32> -> vector<2x3xf32>
    %383 = vector.extract_strided_slice %380 {offsets = [32, 0], sizes = [1, 3], strides = [1, 1]} : vector<33x3xf32> to vector<1x3xf32>
    %384 = vector.broadcast %383 : vector<1x3xf32> to vector<2x3xf32>
    %385 = arith.addf %382, %384 : vector<2x3xf32>
    %386 = arith.negf %385 : vector<2x3xf32>
    %387 = math.exp %386 : vector<2x3xf32>
    %cst_105 = arith.constant 1.000000e+00 : f32
    %388 = vector.broadcast %cst_105 : f32 to vector<2x3xf32>
    %389 = arith.addf %388, %387 : vector<2x3xf32>
    %390 = arith.divf %388, %389 : vector<2x3xf32>
    %c0_106 = arith.constant 0 : index
    %c0_107 = arith.constant 0 : index
    %391 = vector.load %arg7[%c0_106, %c0_107] : memref<2x3xf32, #tpu.memory_space<vmem>>, vector<2x3xf32>
    tpu.vector_store %arg7[%c0_106, %c0_107], %390 {strides = array<i32>} : memref<2x3xf32, #tpu.memory_space<vmem>>, vector<2x3xf32>,
    return
  }
}

</mosaic_0001>

<bundles_post_ra>
// kernel: tpu_custom_call.1
= control target key start
LH: loop header
LB: loop body
LE: loop exit
PB: predicated region body
PF: predicated region fallthrough
CT: control target
= control target key end

     0   :  { %12 = vsyncpa [#allocation3], 0  ;;  %s4228_s0 = inlined_call_operand.hbm [shape: f32[2,8,48], index: 0, kind: input, shape index: {}]   ;;  %s4229_s1 = inlined_call_operand.vmem [shape: bf16[48,32], index: 1, kind: input, shape index: {}]   ;;  %s4230_s2 = inlined_call_operand.vmem [shape: bf16[2,32,96], index: 2, kind: input, shape index: {}]   ;;  %s4231_s3 = inlined_call_operand.vmem [shape: bf16[2,3,32,32], index: 3, kind: input, shape index: {}]   ;;  %s4232_s4 = inlined_call_operand.vmem [shape: f32[2,10,32], index: 4, kind: input, shape index: {}]   ;;  %s4233_s5 = inlined_call_operand.vmem [shape: f32[3,32], index: 5, kind: input, shape index: {}]   ;;  %s4234_s6 = inlined_call_operand.vmem [shape: f32[33,3], index: 6, kind: input, shape index: {}]   ;;  %s4235_s7 = inlined_call_operand.hbm [shape: f32[2,3], index: 7, kind: output, shape index: {}]  }
   0x1   :  { %13 = vsyncpa [#allocation4], 0  ;;  %s3546_s24 = smov [#allocation2]  }
   0x2   :  { %s19_s25 = sshll.u32 %s3546_s24, 4  ;;  %s20_s25 = int_to_ptr.vmem [resolvable:$true] %s19_s25 }
   0x3   :  { %s3510_s26 = scalar_lea.vmem %s20_s25, 256  ;;  %p3515_p1 = scmp.lt.s32.totalorder %s20_s25, %s20_s25 }
   0x4   :  { %p3511_p0 = scmp.ne.s32.totalorder %s20_s25, %s3510_s26  ;;  %p3516_p2 = scmp.lt.s32.totalorder %s3510_s26, %s3510_s26 }
   0x6   :  { %p3517_p3 = por %p3516_p2, %p3515_p1 }
   0x8   :  { %p3518_p4 = pnand %p3517_p3, %p3511_p0 }
   0xa   :  { %3521 = shalt.err (!%p3518_p4)
}
   0xb   :  { %s3547_s27 = smov 128   ;;  %s3548_s28 = smov 8  }
   0xc   :  { %25 = dma.hbm_to_vmem [thread:$0]  %s4228_s0, 256, %s20_s25, [#allocation3], %s3547_s27, %s3547_s27, %s3548_s28  }
   0xd   :  { %3542 = dma.done.wait [#allocation3], 256  }
   0xe   :  { %3543 = vsyncadd [#allocation3], 4294967040  ;;  %v3549_v0 = vmov 0.0   ;;  %vm3550_vm0 = vmmov 0   ;;  %v3387_v1 = vld [vmem:[%s4229_s1 + $0x10] sm:$0xff]   ;;  %v3388_v2 = vld [vmem:[%s4229_s1 + $0x8] sm:$0xff]   ;;  %v197_v9 = vlaneseq }
   0xf   :  { %3060 = vmatprep.subr.bf16.mxu0 %v3549_v0  ;;  %3066 = vmatprep.mubr.msk.bf16.mxu0 %vm3550_vm0, %v3549_v0  ;;  %vm74_vm1 = vcmask 392192   ;;  %v3389_v3 = vld [vmem:[%s4229_s1] sm:$0xff]   ;;  %v43_v5 = vld [vmem:[#allocation2 + $0x8] sm:$0xff]  ;;  %s3551_s18 = smov 32   ;;  %vm152_vm2 = vcmask 261120   ;;  %s3552_s21 = smov 96  }
  0x10   :  { %3070 = vmatprep.subr.bf16.mxu1 %v3549_v0  ;;  %3074 = vmatprep.mubr.msk.bf16.mxu1 %vm3550_vm0, %v3549_v0  ;;  %v42_v4 = vld [vmem:[#allocation2] sm:$0xff]  ;;  %v3390_v7 = vld [vmem:[%s4230_s2 + $0x8] sm:$0xff]   ;;  %v3638_v10 = vshrl.u32 %v197_v9, 7  ;;  %vm232_vm3 = vcmask 64512   ;;  %s3553_s22 = smov 64   ;;  %s3554_s23 = smov 88  }
  0x11   :  { %3061 = vmatpush3.bf16.msra.mxu0 %v3387_v1  ;;  %v44_v6 = vpack.c.bf16 %v43_v5, %v42_v4  ;;  %3071 = vmatpush3.bf16.msra.mxu1 %v3390_v7  ;;  %v3391_v8 = vld [vmem:[%s4230_s2] sm:$0xff]   ;;  %s3555_s24 = smov 120   ;;  %vm358_vm4 = vcmask 1043456   ;;  %s3556_s25 = smov 56   ;;  %vm1139_vm5 = vcmask 130048   ;;  %vm1142_vm6 = vcmask 195584  }
  0x12   :  { %3062 = vmatprep.subr.bf16.mxu0 %v3549_v0  ;;  %3072 = vmatprep.subr.bf16.mxu1 %v3549_v0  ;;  %v3643_v11 = vld [vmem:[%s4232_s4] sm:$0xff]  ;;  %v3646_v12 = vsub.s32 1, %v3638_v10  ;;  %v3676_v33 = vsub.s32 0, %v3638_v10  ;;  %v219_v53 = vsub.s32 2, %v3638_v10  ;;  %s3557_s26 = smov 80   ;;  %s3558_s27 = smov 112  }
  0x13   :  { %v2879_v14 = vld [vmem:[%s4233_s5] ss:$0 sm:$0xff]  ;;  %s3559_s29 = smov 48   ;;  %s3560_s30 = smov 72   ;;  %vm2782_vm7 = vcmask 1041409   ;;  %vm2862_vm8 = vcmask 17408  }
  0x14   :  { %v208_v13 = vrot.slane %v3643_v11, %v3646_v12  ;;  %v200_v34 = vrot.slane %v3643_v11, %v3676_v33  ;;  %v220_v54 = vrot.slane %v3643_v11, %v219_v53  ;;  %s3561_s8 = smov 104   ;;  %s3562_s9 = smov 40  }
  0x15   :  { %3063 = vmatpush3.bf16.msra.mxu0 %v3388_v2  ;;  %3073 = vmatpush3.bf16.msra.mxu1 %v3391_v8  ;;  %s3563_s0 = smov 16   ;;  %s3564_s14 = smov 24  }
  0x16   :  { %3064 = vmatprep.subr.bf16.mxu0 %v3549_v0  ;;  %3078 = vmatprep.subr.bf16.mxu1 %v3549_v0  ;;  %s3565_s19 = smov [#allocation5]  }
  0x17   :  { %210 = vrot.lane.b32.xlu0 %v208_v13, %s3551_s18 }
  0x19   :  { %3065 = vmatpush3.bf16.msra.mxu0 %v3389_v3 }
  0x1a   :  { %3084 = vmatprep.subr.bf16.mxu0 %v3549_v0 }
  0x1c   :  { %3067 = vmatmul.mubr.msk.bf16.vlgmr.msra.gmra.mxu0 %vm74_vm1, %v44_v6 }
  0x1d   :  { %3086 = vmatprep.mubr.msk.bf16.mxu0 %vm3550_vm0, %v3549_v0 }
  0x89   :  { %v211_v24 = vpop.permute.xlu0 %210 }
  0xdc   :  { %v112_v15 = vpop.f32.mrf.mxu0 }
  0xdd   :  { %v3654_v17 = vadd.f32 %v2879_v14, %v112_v15 }
  0xde   :  { %v3068_v16 = vpop.f32.mrf.mxu0 }
  0xdf   :  { %v119_v21 = vmax.f32 %v3654_v17, 0.0 }
  0xe0   :  { %v115_v18 = vpop.f32.mrf.mxu0 }
  0xe1   :  { %v3656_v19 = vadd.f32 %v2879_v14, %v115_v18 }
  0xe2   :  { %v3069_v20 = vpop.f32.mrf.mxu0 }
  0xe3   :  { %v120_v22 = vmax.f32 %v3656_v19, 0.0  ;;  %v3394_v19 = vld [vmem:[%s4231_s3 + $0x18] sm:$0xff]  }
  0xe5   :  { %v135_v23 = vpack.c.bf16 %v120_v22, %v119_v21 }
  0xe7   :  { %3075 = vmatmul.mubr.msk.bf16.vlgmr.msra.gmra.mxu1 %vm152_vm2, %v135_v23 }
  0xe8   :  { %3080 = vmatprep.mubr.msk.bf16.mxu1 %vm3550_vm0, %v3549_v0 }
 0x1a7   :  { %v190_v25 = vpop.f32.mrf.mxu1 }
 0x1a8   :  { %v213_v26 = vadd.f32 %v211_v24, %v190_v25  ;;  %v201_v37 = vadd.f32 %v200_v34, %v190_v25 }
 0x1a9   :  { %v3076_v27 = vpop.f32.mrf.mxu1 }
 0x1aa   :  { %v3667_v28 = vpack.c.bf16 %v213_v26, %v213_v26  ;;  %v3683_v40 = vpack.c.bf16 %v201_v37, %v201_v37 }
 0x1ab   :  { %v193_v29 = vpop.f32.mrf.mxu1 }
 0x1ac   :  { %v214_v30 = vadd.f32 %v211_v24, %v193_v29  ;;  %230 = vrot.lane.b32.xlu0 %v3667_v28, %s3552_s21  ;;  %v202_v41 = vadd.f32 %v200_v34, %v193_v29 }
 0x1ad   :  { %v3077_v31 = vpop.f32.mrf.mxu1 }
 0x1ae   :  { %v3671_v32 = vpack.c.bf16 %v214_v30, %v214_v30  ;;  %v3690_v42 = vpack.c.bf16 %v202_v41, %v202_v41 }
 0x1b0   :  { %280 = vrot.lane.b32.xlu1 %v3671_v32, %s3552_s21 }
 0x21e   :  { %v231_v35 = vpop.permute.xlu0 %230 }
 0x21f   :  { %v237_v36 = vsel %vm232_vm3, %v231_v35, 0 }
 0x220   :  { %3079 = vmatpush3.bf16.xpose.msra.mxu1 %v237_v36 }
 0x221   :  { %3090 = vmatprep.subr.bf16.mxu1 %v3549_v0 }
 0x222   :  { %v281_v38 = vpop.permute.xlu1 %280 }
 0x223   :  { %v286_v39 = vsel %vm232_vm3, %v281_v38, 0 }
 0x224   :  { %3085 = vmatpush3.bf16.xpose.msra.mxu0 %v286_v39 }
 0x225   :  { %3096 = vmatprep.subr.bf16.mxu0 %v3549_v0 }
 0x227   :  { %3081 = vmatmul.mubr.msk.bf16.vlgmr.msra.gmra.mxu1 %vm232_vm3, %v3683_v40 }
 0x228   :  { %3092 = vmatprep.mubr.msk.bf16.mxu1 %vm3550_vm0, %v3549_v0 }
 0x22b   :  { %3087 = vmatmul.mubr.msk.bf16.vlgmr.msra.gmra.mxu0 %vm232_vm3, %v3690_v42 }
 0x22c   :  { %3098 = vmatprep.mubr.msk.bf16.mxu0 %vm3550_vm0, %v3549_v0 }
 0x2e7   :  { %v273_v43 = vpop.f32.mrf.mxu1 }
 0x2e8   :  { %v328_v44 = vsel %vm232_vm3, %v273_v43, -inf }
 0x2e9   :  { %329 = vmax.xlane.f32.xlu1 %v328_v44  ;;  %v3082_v45 = vpop.f32.mrf.mxu1 }
 0x2eb   :  { %v276_v46 = vpop.f32.mrf.mxu1  ;;  %v322_v47 = vpop.f32.mrf.mxu0 }
 0x2ec   :  { %v331_v48 = vsel %vm232_vm3, %v322_v47, -inf }
 0x2ed   :  { %v3083_v49 = vpop.f32.mrf.mxu1  ;;  %332 = vmax.xlane.f32.xlu0 %v331_v48  ;;  %v3088_v50 = vpop.f32.mrf.mxu0 }
 0x2ef   :  { %v325_v51 = vpop.f32.mrf.mxu0 }
 0x2f1   :  { %v3089_v52 = vpop.f32.mrf.mxu0 }
 0x303   :  { %222 = vrot.lane.b32.xlu0 %v220_v54, %s3553_s22 }
 0x372   :  { %v330_v61 = vpop.xlane.xlu1 %329 }
 0x373   :  { %v334_v62 = vsub.f32 %v273_v43, %v330_v61 }
 0x375   :  { %v336_v63 = vmul.f32 1.442695, %v334_v62 }
 0x376   :  { %v333_v55 = vpop.xlane.xlu0 %332 }
 0x377   :  { %v335_v1 = vsub.f32 %v322_v47, %v333_v55  ;;  %3406 = vpow2.f32 %v336_v63 }
 0x379   :  { %v338_v2 = vmul.f32 1.442695, %v335_v1 }
 0x37a   :  { %v223_v56 = vpop.permute.xlu0 %222 }
 0x37b   :  { %v225_v57 = vadd.f32 %v223_v56, %v190_v25  ;;  %v226_v58 = vadd.f32 %v223_v56, %v193_v29  ;;  %3408 = vpow2.f32 %v338_v2 }
 0x37d   :  { %v3703_v59 = vpack.c.bf16 %v225_v57, %v225_v57  ;;  %v3705_v60 = vpack.c.bf16 %v226_v58, %v226_v58 }
 0x37f   :  { %403 = vrot.lane.b32.xlu0 %v3705_v60, %s3553_s22  ;;  %353 = vrot.lane.b32.xlu1 %v3703_v59, %s3553_s22 }
 0x383   :  { %454 = vrot.lane.b32.xlu0 %v3667_v28, %s3554_s23 }
 0x384   :  { %v3407_v3 = vpop.eup %3406 }
 0x385   :  { %v340_v4 = vsel %vm232_vm3, %v3407_v3, 0.0 }
 0x387   :  { %452 = vrot.lane.b32.xlu0 %v3683_v40, %s3555_s24 }
 0x388   :  { %v3409_v5 = vpop.eup %3408 }
 0x389   :  { %v343_v6 = vsel %vm232_vm3, %v3409_v5, 0.0 }
 0x3a3   :  { %341 = vadd.xlane.f32.xlu1 %v340_v4 }
 0x3a7   :  { %344 = vadd.xlane.f32.xlu1 %v343_v6 }
 0x3b8   :  { %505 = vrot.lane.b32.xlu1 %v3671_v32, %s3554_s23 }
 0x3bc   :  { %503 = vrot.lane.b32.xlu1 %v3690_v42, %s3555_s24 }
 0x3f1   :  { %v404_v7 = vpop.permute.xlu0 %403  ;;  %v354_v8 = vpop.permute.xlu1 %353 }
 0x3f2   :  { %v409_v9 = vsel %vm358_vm4, %v404_v7, 0  ;;  %v360_v13 = vsel %vm358_vm4, %v354_v8, 0 }
 0x3f3   :  { %3091 = vmatpush3.bf16.msra.mxu1 %v360_v13  ;;  %3097 = vmatpush3.bf16.msra.mxu0 %v409_v9 }
 0x3f4   :  { %3102 = vmatprep.subr.bf16.mxu1 %v3549_v0  ;;  %3108 = vmatprep.subr.bf16.mxu0 %v3549_v0 }
 0x3f5   :  { %v455_v20 = vpop.permute.xlu0 %454 }
 0x3f6   :  { %v460_v25 = vsel %vm232_vm3, %v455_v20, 0 }
 0x3f9   :  { %v453_v31 = vpop.permute.xlu0 %452 }
 0x42c   :  { %v342_v14 = vpop.xlane.xlu1 %341 }
 0x42d   :  { %3410 = vrcp.f32 %v342_v14 }
 0x430   :  { %v345_v15 = vpop.xlane.xlu1 %344 }
 0x431   :  { %3412 = vrcp.f32 %v345_v15 }
 0x434   :  { %v506_v27 = vpop.permute.xlu1 %505 }
 0x435   :  { %v511_v30 = vsel %vm232_vm3, %v506_v27, 0 }
 0x438   :  { %v504_v34 = vpop.permute.xlu1 %503 }
 0x43a   :  { %v3411_v16 = vpop.eup %3410 }
 0x43b   :  { %v348_v18 = vmul.f32 %v3411_v16, %v3407_v3 }
 0x43d   :  { %v350_v23 = vpack.c.bf16 %v348_v18, %v348_v18 }
 0x43e   :  { %v3413_v24 = vpop.eup %3412 }
 0x43f   :  { %3093 = vmatmul.mubr.msk.bf16.vlgmr.msra.gmra.mxu1 %vm232_vm3, %v350_v23  ;;  %v349_v26 = vmul.f32 %v3413_v24, %v3409_v5 }
 0x440   :  { %3103 = vmatpush3.bf16.xpose.msra.mxu1 %v460_v25  ;;  %3104 = vmatprep.mubr.msk.bf16.mxu1 %vm3550_vm0, %v3549_v0 }
 0x441   :  { %v351_v29 = vpack.c.bf16 %v349_v26, %v349_v26  ;;  %3114 = vmatprep.subr.bf16.mxu1 %v3549_v0 }
 0x443   :  { %3099 = vmatmul.mubr.msk.bf16.vlgmr.msra.gmra.mxu0 %vm232_vm3, %v351_v29 }
 0x444   :  { %3109 = vmatpush3.bf16.xpose.msra.mxu0 %v511_v30  ;;  %3110 = vmatprep.mubr.msk.bf16.mxu0 %vm3550_vm0, %v3549_v0 }
 0x445   :  { %3120 = vmatprep.subr.bf16.mxu0 %v3549_v0 }
 0x447   :  { %3105 = vmatmul.mubr.msk.bf16.vlgmr.msra.gmra.mxu1 %vm232_vm3, %v453_v31 }
 0x448   :  { %3116 = vmatprep.mubr.msk.bf16.mxu1 %vm3550_vm0, %v3549_v0 }
 0x44b   :  { %3111 = vmatmul.mubr.msk.bf16.vlgmr.msra.gmra.mxu0 %vm232_vm3, %v504_v34 }
 0x44c   :  { %3122 = vmatprep.mubr.msk.bf16.mxu0 %vm3550_vm0, %v3549_v0 }
 0x4ff   :  { %v3741_v35 = vpop.f32.mrf.mxu1 }
 0x501   :  { %v3094_v36 = vpop.f32.mrf.mxu1 }
 0x503   :  { %v399_v37 = vpop.f32.mrf.mxu1  ;;  %v3743_v38 = vpop.f32.mrf.mxu0 }
 0x505   :  { %v3095_v39 = vpop.f32.mrf.mxu1  ;;  %v3100_v41 = vpop.f32.mrf.mxu0 }
 0x507   :  { %v448_v43 = vpop.f32.mrf.mxu0  ;;  %v496_v44 = vpop.f32.mrf.mxu1 }
 0x508   :  { %v553_v45 = vsel %vm232_vm3, %v496_v44, -inf }
 0x509   :  { %554 = vmax.xlane.f32.xlu0 %v553_v45  ;;  %v3101_v46 = vpop.f32.mrf.mxu0  ;;  %v3106_v47 = vpop.f32.mrf.mxu1 }
 0x50b   :  { %v499_v48 = vpop.f32.mrf.mxu1  ;;  %v547_v49 = vpop.f32.mrf.mxu0 }
 0x50c   :  { %v556_v50 = vsel %vm232_vm3, %v547_v49, -inf }
 0x50d   :  { %v3107_v51 = vpop.f32.mrf.mxu1  ;;  %557 = vmax.xlane.f32.xlu1 %v556_v50  ;;  %v3112_v52 = vpop.f32.mrf.mxu0 }
 0x50f   :  { %v550_v54 = vpop.f32.mrf.mxu0 }
 0x511   :  { %v3113_v55 = vpop.f32.mrf.mxu0 }
 0x51e   :  { %577 = vrot.lane.b32.xlu1 %v3703_v59, %s3556_s25 }
 0x522   :  { %675 = vrot.lane.b32.xlu1 %v3667_v28, %s3557_s26 }
 0x526   :  { %725 = vrot.lane.b32.xlu1 %v3671_v32, %s3557_s26 }
 0x52a   :  { %723 = vrot.lane.b32.xlu1 %v3690_v42, %s3558_s27 }
 0x592   :  { %v555_v56 = vpop.xlane.xlu0 %554 }
 0x593   :  { %v559_v57 = vsub.f32 %v496_v44, %v555_v56 }
 0x595   :  { %v561_v58 = vmul.f32 1.442695, %v559_v57 }
 0x596   :  { %v558_v61 = vpop.xlane.xlu1 %557 }
 0x597   :  { %3414 = vpow2.f32 %v561_v58  ;;  %v560_v62 = vsub.f32 %v547_v49, %v558_v61 }
 0x599   :  { %v563_v63 = vmul.f32 1.442695, %v560_v62 }
 0x59a   :  { %v578_v1 = vpop.permute.xlu1 %577 }
 0x59b   :  { %3416 = vpow2.f32 %v563_v63  ;;  %v583_v2 = vsel %vm358_vm4, %v578_v1, 0 }
 0x59c   :  { %3115 = vmatpush3.bf16.msra.mxu1 %v583_v2 }
 0x59d   :  { %3126 = vmatprep.subr.bf16.mxu1 %v3549_v0 }
 0x59e   :  { %v676_v15 = vpop.permute.xlu1 %675 }
 0x59f   :  { %v681_v23 = vsel %vm232_vm3, %v676_v15, 0 }
 0x5a2   :  { %v726_v25 = vpop.permute.xlu1 %725 }
 0x5a3   :  { %v731_v27 = vsel %vm232_vm3, %v726_v25, 0 }
 0x5a4   :  { %v3415_v3 = vpop.eup %3414 }
 0x5a5   :  { %v565_v4 = vsel %vm232_vm3, %v3415_v3, 0.0 }
 0x5a6   :  { %566 = vadd.xlane.f32.xlu0 %v565_v4  ;;  %v724_v30 = vpop.permute.xlu1 %723 }
 0x5a8   :  { %v3417_v5 = vpop.eup %3416 }
 0x5a9   :  { %v568_v6 = vsel %vm232_vm3, %v3417_v5, 0.0 }
 0x5aa   :  { %569 = vadd.xlane.f32.xlu0 %v568_v6 }
 0x5c0   :  { %625 = vrot.lane.b32.xlu0 %v3705_v60, %s3556_s25 }
 0x5c4   :  { %673 = vrot.lane.b32.xlu0 %v3683_v40, %s3558_s27 }
 0x62f   :  { %v567_v7 = vpop.xlane.xlu0 %566 }
 0x630   :  { %3418 = vrcp.f32 %v567_v7 }
 0x633   :  { %v570_v8 = vpop.xlane.xlu0 %569 }
 0x634   :  { %3420 = vrcp.f32 %v570_v8 }
 0x637   :  { %v626_v9 = vpop.permute.xlu0 %625 }
 0x638   :  { %v631_v13 = vsel %vm358_vm4, %v626_v9, 0 }
 0x639   :  { %3121 = vmatpush3.bf16.msra.mxu0 %v631_v13 }
 0x63a   :  { %3132 = vmatprep.subr.bf16.mxu0 %v3549_v0 }
 0x63b   :  { %v674_v29 = vpop.permute.xlu0 %673 }
 0x63d   :  { %v3419_v14 = vpop.eup %3418 }
 0x63e   :  { %v573_v16 = vmul.f32 %v3419_v14, %v3415_v3 }
 0x640   :  { %v575_v18 = vpack.c.bf16 %v573_v16, %v573_v16 }
 0x641   :  { %v3421_v20 = vpop.eup %3420 }
 0x642   :  { %3117 = vmatmul.mubr.msk.bf16.vlgmr.msra.gmra.mxu1 %vm232_vm3, %v575_v18  ;;  %v574_v24 = vmul.f32 %v3421_v20, %v3417_v5 }
 0x643   :  { %3127 = vmatpush3.bf16.xpose.msra.mxu1 %v681_v23  ;;  %3128 = vmatprep.mubr.msk.bf16.mxu1 %vm3550_vm0, %v3549_v0 }
 0x644   :  { %v576_v26 = vpack.c.bf16 %v574_v24, %v574_v24  ;;  %3138 = vmatprep.subr.bf16.mxu1 %v3549_v0 }
 0x646   :  { %3123 = vmatmul.mubr.msk.bf16.vlgmr.msra.gmra.mxu0 %vm232_vm3, %v576_v26 }
 0x647   :  { %3133 = vmatpush3.bf16.xpose.msra.mxu0 %v731_v27  ;;  %3134 = vmatprep.mubr.msk.bf16.mxu0 %vm3550_vm0, %v3549_v0 }
 0x648   :  { %3144 = vmatprep.subr.bf16.mxu0 %v3549_v0 }
 0x64a   :  { %3129 = vmatmul.mubr.msk.bf16.vlgmr.msra.gmra.mxu1 %vm232_vm3, %v674_v29 }
 0x64b   :  { %3140 = vmatprep.mubr.msk.bf16.mxu1 %vm3550_vm0, %v3549_v0 }
 0x64e   :  { %3135 = vmatmul.mubr.msk.bf16.vlgmr.msra.gmra.mxu0 %vm232_vm3, %v724_v30 }
 0x64f   :  { %3146 = vmatprep.mubr.msk.bf16.mxu0 %vm3550_vm0, %v3549_v0 }
 0x702   :  { %v3781_v31 = vpop.f32.mrf.mxu1 }
 0x704   :  { %v3118_v34 = vpop.f32.mrf.mxu1 }
 0x706   :  { %v622_v36 = vpop.f32.mrf.mxu1  ;;  %v3783_v37 = vpop.f32.mrf.mxu0 }
 0x707   :  { %v3357_v39 = vpack.i.bf16 %v3783_v37, %v3781_v31 }
 0x708   :  { %v3119_v41 = vpop.f32.mrf.mxu1  ;;  %v3124_v43 = vpop.f32.mrf.mxu0 }
 0x70a   :  { %v670_v44 = vpop.f32.mrf.mxu0  ;;  %v717_v45 = vpop.f32.mrf.mxu1 }
 0x70b   :  { %v773_v46 = vsel %vm232_vm3, %v717_v45, -inf }
 0x70c   :  { %774 = vmax.xlane.f32.xlu0 %v773_v46  ;;  %v3125_v47 = vpop.f32.mrf.mxu0  ;;  %v3130_v48 = vpop.f32.mrf.mxu1 }
 0x70e   :  { %v720_v49 = vpop.f32.mrf.mxu1  ;;  %v767_v50 = vpop.f32.mrf.mxu0 }
 0x70f   :  { %v776_v51 = vsel %vm232_vm3, %v767_v50, -inf }
 0x710   :  { %v3131_v52 = vpop.f32.mrf.mxu1  ;;  %777 = vmax.xlane.f32.xlu1 %v776_v51  ;;  %v3136_v54 = vpop.f32.mrf.mxu0 }
 0x712   :  { %v770_v55 = vpop.f32.mrf.mxu0 }
 0x714   :  { %v3137_v56 = vpop.f32.mrf.mxu0 }
 0x721   :  { %797 = vrot.lane.b32.xlu1 %v3703_v59, %s3559_s29 }
 0x725   :  { %895 = vrot.lane.b32.xlu1 %v3667_v28, %s3560_s30 }
 0x729   :  { %945 = vrot.lane.b32.xlu1 %v3671_v32, %s3560_s30 }
 0x72d   :  { %943 = vrot.lane.b32.xlu1 %v3690_v42, %s3561_s8 }
 0x795   :  { %v775_v57 = vpop.xlane.xlu0 %774 }
 0x796   :  { %v779_v58 = vsub.f32 %v717_v45, %v775_v57 }
 0x798   :  { %v781_v61 = vmul.f32 1.442695, %v779_v58 }
 0x799   :  { %v778_v62 = vpop.xlane.xlu1 %777 }
 0x79a   :  { %3422 = vpow2.f32 %v781_v61  ;;  %v780_v63 = vsub.f32 %v767_v50, %v778_v62 }
 0x79c   :  { %v783_v1 = vmul.f32 1.442695, %v780_v63 }
 0x79d   :  { %v798_v2 = vpop.permute.xlu1 %797 }
 0x79e   :  { %3424 = vpow2.f32 %v783_v1  ;;  %v803_v3 = vsel %vm358_vm4, %v798_v2, 0 }
 0x79f   :  { %3139 = vmatpush3.bf16.msra.mxu1 %v803_v3 }
 0x7a0   :  { %3150 = vmatprep.subr.bf16.mxu1 %v3549_v0 }
 0x7a1   :  { %v896_v13 = vpop.permute.xlu1 %895 }
 0x7a2   :  { %v901_v18 = vsel %vm232_vm3, %v896_v13, 0  ;;  %v3392_v13 = vld [vmem:[%s4231_s3 + $0x8] sm:$0xff]  }
 0x7a5   :  { %v946_v20 = vpop.permute.xlu1 %945 }
 0x7a6   :  { %v951_v24 = vsel %vm232_vm3, %v946_v20, 0 }
 0x7a7   :  { %v3423_v28 = vpop.eup %3422 }
 0x7a8   :  { %v785_v32 = vsel %vm232_vm3, %v3423_v28, 0.0 }
 0x7a9   :  { %786 = vadd.xlane.f32.xlu0 %v785_v32  ;;  %v944_v26 = vpop.permute.xlu1 %943 }
 0x7ab   :  { %v3425_v4 = vpop.eup %3424 }
 0x7ac   :  { %v788_v42 = vsel %vm232_vm3, %v3425_v4, 0.0 }
 0x7ad   :  { %789 = vadd.xlane.f32.xlu0 %v788_v42 }
 0x7c3   :  { %845 = vrot.lane.b32.xlu0 %v3705_v60, %s3559_s29 }
 0x7c7   :  { %893 = vrot.lane.b32.xlu0 %v3683_v40, %s3561_s8 }
 0x832   :  { %v787_v5 = vpop.xlane.xlu0 %786 }
 0x833   :  { %3426 = vrcp.f32 %v787_v5 }
 0x836   :  { %v790_v6 = vpop.xlane.xlu0 %789 }
 0x837   :  { %3428 = vrcp.f32 %v790_v6 }
 0x83a   :  { %v846_v7 = vpop.permute.xlu0 %845 }
 0x83b   :  { %v851_v8 = vsel %vm358_vm4, %v846_v7, 0 }
 0x83c   :  { %3145 = vmatpush3.bf16.msra.mxu0 %v851_v8 }
 0x83d   :  { %3156 = vmatprep.subr.bf16.mxu0 %v3549_v0 }
 0x83e   :  { %v894_v25 = vpop.permute.xlu0 %893 }
 0x840   :  { %v3427_v9 = vpop.eup %3426 }
 0x841   :  { %v793_v14 = vmul.f32 %v3427_v9, %v3423_v28 }
 0x843   :  { %v795_v15 = vpack.c.bf16 %v793_v14, %v793_v14  ;;  %v3393_v14 = vld [vmem:[%s4231_s3] sm:$0xff]  }
 0x844   :  { %v3429_v16 = vpop.eup %3428 }
 0x845   :  { %3141 = vmatmul.mubr.msk.bf16.vlgmr.msra.gmra.mxu1 %vm232_vm3, %v795_v15  ;;  %v794_v40 = vmul.f32 %v3429_v16, %v3425_v4 }
 0x846   :  { %3151 = vmatpush3.bf16.xpose.msra.mxu1 %v901_v18  ;;  %3152 = vmatprep.mubr.msk.bf16.mxu1 %vm3550_vm0, %v3549_v0 }
 0x847   :  { %v796_v23 = vpack.c.bf16 %v794_v40, %v794_v40  ;;  %3162 = vmatprep.subr.bf16.mxu1 %v3549_v0 }
 0x849   :  { %3147 = vmatmul.mubr.msk.bf16.vlgmr.msra.gmra.mxu0 %vm232_vm3, %v796_v23 }
 0x84a   :  { %3157 = vmatpush3.bf16.xpose.msra.mxu0 %v951_v24  ;;  %3158 = vmatprep.mubr.msk.bf16.mxu0 %vm3550_vm0, %v3549_v0 }
 0x84b   :  { %3168 = vmatprep.subr.bf16.mxu0 %v3549_v0 }
 0x84d   :  { %3153 = vmatmul.mubr.msk.bf16.vlgmr.msra.gmra.mxu1 %vm232_vm3, %v894_v25 }
 0x84e   :  { %3164 = vmatprep.mubr.msk.bf16.mxu1 %vm3550_vm0, %v3549_v0 }
 0x851   :  { %3159 = vmatmul.mubr.msk.bf16.vlgmr.msra.gmra.mxu0 %vm232_vm3, %v944_v26 }
 0x852   :  { %3170 = vmatprep.mubr.msk.bf16.mxu0 %vm3550_vm0, %v3549_v0 }
 0x905   :  { %v839_v27 = vpop.f32.mrf.mxu1 }
 0x907   :  { %v3142_v29 = vpop.f32.mrf.mxu1 }
 0x909   :  { %v842_v30 = vpop.f32.mrf.mxu1  ;;  %v887_v34 = vpop.f32.mrf.mxu0 }
 0x90a   :  { %v3362_v56 = vpack.i.bf16 %v887_v34, %v839_v27 }
 0x90b   :  { %v3143_v36 = vpop.f32.mrf.mxu1  ;;  %v3148_v41 = vpop.f32.mrf.mxu0 }
 0x90d   :  { %v890_v43 = vpop.f32.mrf.mxu0  ;;  %v937_v44 = vpop.f32.mrf.mxu1 }
 0x90e   :  { %v993_v45 = vsel %vm232_vm3, %v937_v44, -inf }
 0x90f   :  { %994 = vmax.xlane.f32.xlu0 %v993_v45  ;;  %v3149_v46 = vpop.f32.mrf.mxu0  ;;  %v3154_v47 = vpop.f32.mrf.mxu1 }
 0x911   :  { %v940_v48 = vpop.f32.mrf.mxu1  ;;  %v987_v49 = vpop.f32.mrf.mxu0 }
 0x912   :  { %v996_v50 = vsel %vm232_vm3, %v987_v49, -inf }
 0x913   :  { %v3155_v51 = vpop.f32.mrf.mxu1  ;;  %997 = vmax.xlane.f32.xlu1 %v996_v50  ;;  %v3160_v52 = vpop.f32.mrf.mxu0 }
 0x915   :  { %v990_v54 = vpop.f32.mrf.mxu0 }
 0x917   :  { %v3161_v55 = vpop.f32.mrf.mxu0 }
 0x924   :  { %1017 = vrot.lane.b32.xlu1 %v3703_v59, %s3562_s9 }
 0x928   :  { %3358 = vrot.lane.b32.xlu1 %v3357_v39, %s3548_s28 }
 0x92c   :  { %3363 = vrot.lane.b32.xlu1 %v3362_v56, %s3563_s0 }
 0x998   :  { %v995_v57 = vpop.xlane.xlu0 %994 }
 0x999   :  { %v999_v58 = vsub.f32 %v937_v44, %v995_v57 }
 0x99b   :  { %v1001_v61 = vmul.f32 1.442695, %v999_v58 }
 0x99c   :  { %v998_v62 = vpop.xlane.xlu1 %997 }
 0x99d   :  { %3430 = vpow2.f32 %v1001_v61  ;;  %v1000_v63 = vsub.f32 %v987_v49, %v998_v62 }
 0x99f   :  { %v1003_v1 = vmul.f32 1.442695, %v1000_v63 }
 0x9a0   :  { %v1018_v2 = vpop.permute.xlu1 %1017 }
 0x9a1   :  { %3432 = vpow2.f32 %v1003_v1  ;;  %v1023_v59 = vsel %vm358_vm4, %v1018_v2, 0 }
 0x9a2   :  { %3163 = vmatpush3.bf16.msra.mxu1 %v1023_v59 }
 0x9a3   :  { %3174 = vmatprep.subr.bf16.mxu1 %v3549_v0 }
 0x9a4   :  { %v3359_v27 = vpop.permute.xlu1 %3358 }
 0x9a5   :  { %v3361_v30 = vunpack.i.h.bf16 %v3359_v27  ;;  %v3360_v34 = vunpack.i.l.bf16 %v3359_v27 }
 0x9a7   :  { %v1138_v44 = vsel %vm232_vm3, %v3743_v38, %v3361_v30  ;;  %v1137_v45 = vsel %vm232_vm3, %v3741_v35, %v3360_v34  ;;  %v1148_v38 = vsub.s32 3, %v3638_v10  ;;  %v3397_v30 = vld [vmem:[%s4231_s3 + $0x20] sm:$0xff]   ;;  %v1250_v34 = vsub.s32 6, %v3638_v10 }
 0x9a8   :  { %v3364_v29 = vpop.permute.xlu1 %3363 }
 0x9a9   :  { %v3366_v36 = vunpack.i.h.bf16 %v3364_v29  ;;  %v3365_v41 = vunpack.i.l.bf16 %v3364_v29  ;;  %v1149_v35 = vrot.slane %v3643_v11, %v1148_v38  ;;  %v3396_v29 = vld [vmem:[%s4231_s3 + $0x28] sm:$0xff]  }
 0x9aa   :  { %v3431_v31 = vpop.eup %3430 }
 0x9ab   :  { %v1005_v37 = vsel %vm232_vm3, %v3431_v31, 0.0  ;;  %v1140_v48 = vsel %vm1139_vm5, %v1137_v45, %v3365_v41  ;;  %v1141_v49 = vsel %vm1139_vm5, %v1138_v44, %v3366_v36  ;;  %v1251_v36 = vrot.slane %v3643_v11, %v1250_v34 }
 0x9ac   :  { %1006 = vadd.xlane.f32.xlu0 %v1005_v37 }
 0x9ae   :  { %v3433_v39 = vpop.eup %3432 }
 0x9af   :  { %v1008_v3 = vsel %vm232_vm3, %v3433_v39, 0.0 }
 0x9b0   :  { %1009 = vadd.xlane.f32.xlu0 %v1008_v3 }
 0x9c6   :  { %1065 = vrot.lane.b32.xlu0 %v3705_v60, %s3562_s9 }
 0xa35   :  { %v1007_v28 = vpop.xlane.xlu0 %1006 }
 0xa36   :  { %3434 = vrcp.f32 %v1007_v28 }
 0xa39   :  { %v1010_v32 = vpop.xlane.xlu0 %1009 }
 0xa3a   :  { %3436 = vrcp.f32 %v1010_v32 }
 0xa3d   :  { %v1066_v4 = vpop.permute.xlu0 %1065 }
 0xa3e   :  { %v1071_v42 = vsel %vm358_vm4, %v1066_v4, 0 }
 0xa3f   :  { %3169 = vmatpush3.bf16.msra.mxu0 %v1071_v42 }
 0xa40   :  { %3182 = vmatprep.subr.bf16.mxu0 %v3549_v0 }
 0xa43   :  { %v3435_v5 = vpop.eup %3434 }
 0xa44   :  { %v1013_v6 = vmul.f32 %v3435_v5, %v3431_v31 }
 0xa46   :  { %v1015_v7 = vpack.c.bf16 %v1013_v6, %v1013_v6 }
 0xa47   :  { %v3437_v8 = vpop.eup %3436 }
 0xa48   :  { %3165 = vmatmul.mubr.msk.bf16.vlgmr.msra.gmra.mxu1 %vm232_vm3, %v1015_v7  ;;  %v1014_v9 = vmul.f32 %v3437_v8, %v3433_v39 }
 0xa49   :  { %3178 = vmatprep.mubr.msk.bf16.mxu1 %vm3550_vm0, %v3549_v0  ;;  %3175 = vmatpush3.bf16.msra.mxu1 %v3392_v13 }
 0xa4a   :  { %v1016_v60 = vpack.c.bf16 %v1014_v9, %v1014_v9  ;;  %3176 = vmatprep.subr.bf16.mxu1 %v3549_v0 }
 0xa4c   :  { %3171 = vmatmul.mubr.msk.bf16.vlgmr.msra.gmra.mxu0 %vm232_vm3, %v1016_v60  ;;  %v1237_v60 = vsub.s32 4, %v3638_v10 }
 0xa4d   :  { %3186 = vmatprep.mubr.msk.bf16.mxu0 %vm3550_vm0, %v3549_v0  ;;  %3177 = vmatpush3.bf16.msra.mxu1 %v3393_v14 }
 0xa4e   :  { %3190 = vmatprep.subr.bf16.mxu1 %v3549_v0  ;;  %3183 = vmatpush3.bf16.msra.mxu0 %v3394_v19 }
 0xa4f   :  { %3184 = vmatprep.subr.bf16.mxu0 %v3549_v0 }
 0xb08   :  { %v1059_v15 = vpop.f32.mrf.mxu1 }
 0xb0a   :  { %v3166_v16 = vpop.f32.mrf.mxu1 }
 0xb0b   :  { %v1243_v16 = vsub.s32 5, %v3638_v10 }
 0xb0c   :  { %v1062_v18 = vpop.f32.mrf.mxu1  ;;  %v1107_v40 = vpop.f32.mrf.mxu0 }
 0xb0d   :  { %v3367_v20 = vpack.i.bf16 %v1107_v40, %v1059_v15  ;;  %v1238_v15 = vrot.slane %v3643_v11, %v1237_v60 }
 0xb0e   :  { %v3167_v23 = vpop.f32.mrf.mxu1  ;;  %v3172_v24 = vpop.f32.mrf.mxu0 }
 0xb0f   :  { %3368 = vrot.lane.b32.xlu0 %v3367_v20, %s3564_s14  ;;  %v1244_v23 = vrot.slane %v3643_v11, %v1243_v16 }
 0xb10   :  { %v1110_v25 = vpop.f32.mrf.mxu0 }
 0xb12   :  { %v3173_v26 = vpop.f32.mrf.mxu0 }
 0xb81   :  { %v3369_v43 = vpop.permute.xlu0 %3368 }
 0xb82   :  { %v3371_v46 = vunpack.i.h.bf16 %v3369_v43  ;;  %v3370_v47 = vunpack.i.l.bf16 %v3369_v43 }
 0xb84   :  { %v1144_v50 = vsel %vm1142_vm6, %v1141_v49, %v3371_v46  ;;  %v1143_v51 = vsel %vm1142_vm6, %v1140_v48, %v3370_v47 }
 0xb85   :  { %v1145_v52 = vpack.c.bf16 %v1144_v50, %v1143_v51 }
 0xb87   :  { %3179 = vmatmul.mubr.msk.bf16.vlgmr.msra.gmra.mxu1 %vm152_vm2, %v1145_v52 }
 0xb88   :  { %3194 = vmatprep.mubr.msk.bf16.mxu1 %vm3550_vm0, %v3549_v0  ;;  %3191 = vmatpush3.bf16.msra.mxu1 %v3396_v29 }
 0xb89   :  { %3192 = vmatprep.subr.bf16.mxu1 %v3549_v0 }
 0xb8c   :  { %3193 = vmatpush3.bf16.msra.mxu1 %v3397_v30 }
 0xb8d   :  { %3206 = vmatprep.subr.bf16.mxu1 %v3549_v0 }
 0xc47   :  { %v1199_v54 = vpop.f32.mrf.mxu1 }
 0xc48   :  { %v1200_v55 = vadd.f32 %v1199_v54, %v1149_v35 }
 0xc49   :  { %v3180_v56 = vpop.f32.mrf.mxu1 }
 0xc4a   :  { %v1206_v57 = vadd.f32 %v1200_v55, %v119_v21 }
 0xc4b   :  { %v1202_v58 = vpop.f32.mrf.mxu1 }
 0xc4c   :  { %v1203_v61 = vadd.f32 %v1202_v58, %v1149_v35  ;;  %v1208_v62 = vsel %vm152_vm2, %v1206_v57, 0.0 }
 0xc4d   :  { %1209 = vadd.xlane.f32.xlu1 %v1208_v62  ;;  %v3181_v63 = vpop.f32.mrf.mxu1 }
 0xc4e   :  { %v1207_v1 = vadd.f32 %v1203_v61, %v120_v22  ;;  %v3395_v22 = vld [vmem:[%s4231_s3 + $0x10] sm:$0xff]   ;;  %v1321_v61 = vsub.s32 7, %v3638_v10 }
 0xc4f   :  { %3185 = vmatpush3.bf16.msra.mxu0 %v3395_v22 }
 0xc50   :  { %v1211_v2 = vsel %vm152_vm2, %v1207_v1, 0.0  ;;  %3198 = vmatprep.subr.bf16.mxu0 %v3549_v0  ;;  %v1322_v62 = vrot.slane %v3643_v11, %v1321_v61 }
 0xc51   :  { %1212 = vadd.xlane.f32.xlu0 %v1211_v2 }
 0xcd6   :  { %v1210_v59 = vpop.xlane.xlu1 %1209 }
 0xcd7   :  { %v1215_v31 = vmul.f32 0.03125, %v1210_v59 }
 0xcd9   :  { %v1217_v37 = vsub.f32 %v1206_v57, %v1215_v31 }
 0xcda   :  { %v1213_v39 = vpop.xlane.xlu0 %1212 }
 0xcdb   :  { %v1216_v3 = vmul.f32 0.03125, %v1213_v39  ;;  %v1219_v28 = vmul.f32 %v1217_v37, %v1217_v37 }
 0xcdd   :  { %v1218_v17 = vsub.f32 %v1207_v1, %v1216_v3  ;;  %v1221_v21 = vsel %vm152_vm2, %v1219_v28, 0.0 }
 0xcde   :  { %1222 = vadd.xlane.f32.xlu0 %v1221_v21 }
 0xcdf   :  { %v1220_v32 = vmul.f32 %v1218_v17, %v1218_v17 }
 0xce1   :  { %v1224_v4 = vsel %vm152_vm2, %v1220_v32, 0.0 }
 0xce2   :  { %1225 = vadd.xlane.f32.xlu1 %v1224_v4 }
 0xd67   :  { %v1223_v42 = vpop.xlane.xlu0 %1222 }
 0xd68   :  { %v1227_v5 = vmul.f32 0.03125, %v1223_v42 }
 0xd6a   :  { %v1229_v6 = vadd.f32 1e-05, %v1227_v5 }
 0xd6b   :  { %v1226_v7 = vpop.xlane.xlu1 %1225 }
 0xd6c   :  { %3438 = vrsqrt.f32 %v1229_v6  ;;  %v1228_v8 = vmul.f32 0.03125, %v1226_v7 }
 0xd6e   :  { %v1230_v9 = vadd.f32 1e-05, %v1228_v8  ;;  %v3398_v8 = vld [vmem:[%s4230_s2 + $0x18] sm:$0xff]  }
 0xd70   :  { %3440 = vrsqrt.f32 %v1230_v9  ;;  %v3399_v9 = vld [vmem:[%s4230_s2 + $0x10] sm:$0xff]  }
 0xd79   :  { %v3439_v13 = vpop.eup %3438 }
 0xd7a   :  { %v1233_v14 = vmul.f32 %v3439_v13, %v1217_v37  ;;  %v3931_v13 = vld [vmem:[%s4232_s4 + $0x10] sm:$0xff] }
 0xd7c   :  { %v1239_v20 = vmul.f32 %v1238_v15, %v1233_v14  ;;  %v1508_v14 = vrot.slane %v3931_v13, %v3646_v12 }
 0xd7d   :  { %v3441_v18 = vpop.eup %3440 }
 0xd7e   :  { %v1234_v40 = vmul.f32 %v3441_v18, %v1218_v17  ;;  %v1245_v25 = vadd.f32 %v1244_v23, %v1239_v20 }
 0xd80   :  { %v1240_v24 = vmul.f32 %v1238_v15, %v1234_v40 }
 0xd82   :  { %v1246_v26 = vadd.f32 %v1244_v23, %v1240_v24 }
 0xd84   :  { %v1247_v27 = vpack.c.bf16 %v1246_v26, %v1245_v25 }
 0xd86   :  { %3187 = vmatmul.mubr.msk.bf16.vlgmr.msra.gmra.mxu0 %vm152_vm2, %v1247_v27 }
 0xd87   :  { %3202 = vmatprep.mubr.msk.bf16.mxu0 %vm3550_vm0, %v3549_v0  ;;  %3199 = vmatpush3.bf16.msra.mxu0 %v3398_v8 }
 0xd88   :  { %3200 = vmatprep.subr.bf16.mxu0 %v3549_v0 }
 0xd8b   :  { %3201 = vmatpush3.bf16.msra.mxu0 %v3399_v9 }
 0xd8c   :  { %3212 = vmatprep.subr.bf16.mxu0 %v3549_v0 }
 0xe46   :  { %v1301_v41 = vpop.f32.mrf.mxu0 }
 0xe47   :  { %v1302_v43 = vadd.f32 %v1301_v41, %v1251_v36 }
 0xe48   :  { %v3188_v44 = vpop.f32.mrf.mxu0 }
 0xe49   :  { %v1310_v45 = vmul.f32 0.70710677, %v1302_v43  ;;  %v1308_v35 = vmul.f32 0.5, %v1302_v43 }
 0xe4a   :  { %v1304_v46 = vpop.f32.mrf.mxu0 }
 0xe4b   :  { %3442 = verf.f32 %v1310_v45  ;;  %v1305_v47 = vadd.f32 %v1304_v46, %v1251_v36 }
 0xe4c   :  { %v3189_v48 = vpop.f32.mrf.mxu0 }
 0xe4d   :  { %v1311_v49 = vmul.f32 0.70710677, %v1305_v47  ;;  %v1309_v54 = vmul.f32 0.5, %v1305_v47 }
 0xe4f   :  { %3444 = verf.f32 %v1311_v49 }
 0xe58   :  { %v3443_v50 = vpop.eup %3442 }
 0xe59   :  { %v1314_v51 = vadd.f32 1.0, %v3443_v50 }
 0xe5b   :  { %v1316_v56 = vmul.f32 %v1314_v51, %v1308_v35 }
 0xe5c   :  { %v3445_v52 = vpop.eup %3444 }
 0xe5d   :  { %v1315_v55 = vadd.f32 1.0, %v3445_v52 }
 0xe5f   :  { %v1317_v57 = vmul.f32 %v1315_v55, %v1309_v54 }
 0xe61   :  { %v1318_v58 = vpack.c.bf16 %v1317_v57, %v1316_v56  ;;  %v1500_v57 = vrot.slane %v3931_v13, %v3676_v33 }
 0xe63   :  { %3195 = vmatmul.mubr.msk.bf16.vlgmr.msra.gmra.mxu1 %vm152_vm2, %v1318_v58 }
 0xe64   :  { %3208 = vmatprep.mubr.msk.bf16.mxu1 %vm3550_vm0, %v3549_v0 }
 0xf23   :  { %v1372_v63 = vpop.f32.mrf.mxu1 }
 0xf24   :  { %v1373_v1 = vadd.f32 %v1372_v63, %v1322_v62 }
 0xf25   :  { %v3196_v2 = vpop.f32.mrf.mxu1 }
 0xf26   :  { %v1379_v59 = vadd.f32 %v1373_v1, %v1245_v25  ;;  %v122_v25 = vld [vmem:[%s4232_s4 + $0x8] sm:$0x3] }
 0xf27   :  { %v1375_v31 = vpop.f32.mrf.mxu1  ;;  %v1410_v29 = vrot.slane %v122_v25, %v3676_v33  ;;  %v1416_v43 = vrot.slane %v122_v25, %v3646_v12 }
 0xf28   :  { %v1376_v37 = vadd.f32 %v1375_v31, %v1322_v62  ;;  %v1381_v39 = vsel %vm152_vm2, %v1379_v59, 0.0 }
 0xf29   :  { %1382 = vadd.xlane.f32.xlu0 %v1381_v39  ;;  %v3197_v3 = vpop.f32.mrf.mxu1 }
 0xf2a   :  { %v1380_v28 = vadd.f32 %v1376_v37, %v1246_v26 }
 0xf2c   :  { %v1384_v17 = vsel %vm152_vm2, %v1380_v28, 0.0 }
 0xf2d   :  { %1385 = vadd.xlane.f32.xlu1 %v1384_v17 }
 0xfb2   :  { %v1383_v21 = vpop.xlane.xlu0 %1382 }
 0xfb3   :  { %v1387_v32 = vmul.f32 0.03125, %v1383_v21 }
 0xfb5   :  { %v1389_v4 = vsub.f32 %v1379_v59, %v1387_v32 }
 0xfb6   :  { %v1386_v19 = vpop.xlane.xlu1 %1385 }
 0xfb7   :  { %v1388_v22 = vmul.f32 0.03125, %v1386_v19  ;;  %v1391_v11 = vmul.f32 %v1389_v4, %v1389_v4 }
 0xfb9   :  { %v1390_v42 = vsub.f32 %v1380_v28, %v1388_v22  ;;  %v1393_v5 = vsel %vm152_vm2, %v1391_v11, 0.0 }
 0xfba   :  { %1394 = vadd.xlane.f32.xlu0 %v1393_v5 }
 0xfbb   :  { %v1392_v6 = vmul.f32 %v1390_v42, %v1390_v42 }
 0xfbd   :  { %v1396_v7 = vsel %vm152_vm2, %v1392_v6, 0.0 }
 0xfbe   :  { %1397 = vadd.xlane.f32.xlu1 %v1396_v7 }
 0xfd0   :  { %1510 = vrot.lane.b32.xlu0 %v1508_v14, %s3551_s18 }
0x1043   :  { %v1395_v15 = vpop.xlane.xlu0 %1394 }
0x1044   :  { %v1399_v18 = vmul.f32 0.03125, %v1395_v15 }
0x1046   :  { %v1401_v40 = vadd.f32 1e-05, %v1399_v18 }
0x1047   :  { %v1398_v20 = vpop.xlane.xlu1 %1397  ;;  %v1511_v48 = vpop.permute.xlu0 %1510 }
0x1048   :  { %3446 = vrsqrt.f32 %v1401_v40  ;;  %v1400_v23 = vmul.f32 0.03125, %v1398_v20 }
0x104a   :  { %v1402_v24 = vadd.f32 1e-05, %v1400_v23 }
0x104c   :  { %3448 = vrsqrt.f32 %v1402_v24 }
0x1055   :  { %v3447_v26 = vpop.eup %3446 }
0x1056   :  { %v1405_v27 = vmul.f32 %v3447_v26, %v1389_v4 }
0x1058   :  { %v1411_v41 = vmul.f32 %v1410_v29, %v1405_v27 }
0x1059   :  { %v3449_v30 = vpop.eup %3448 }
0x105a   :  { %v1406_v36 = vmul.f32 %v3449_v30, %v1390_v42  ;;  %v3941_v45 = vadd.f32 %v1416_v43, %v1411_v41  ;;  %v1520_v42 = vrot.slane %v3931_v13, %v219_v53 }
0x105c   :  { %v1412_v44 = vmul.f32 %v1410_v29, %v1406_v36 }
0x105e   :  { %v3943_v46 = vadd.f32 %v1416_v43, %v1412_v44 }
0x1060   :  { %v1435_v47 = vpack.c.bf16 %v3943_v46, %v3941_v45 }
0x1062   :  { %3203 = vmatmul.mubr.msk.bf16.vlgmr.msra.gmra.mxu0 %vm152_vm2, %v1435_v47 }
0x1063   :  { %3214 = vmatprep.mubr.msk.bf16.mxu0 %vm3550_vm0, %v3549_v0 }
0x1122   :  { %v1490_v49 = vpop.f32.mrf.mxu0 }
0x1123   :  { %v1513_v50 = vadd.f32 %v1511_v48, %v1490_v49  ;;  %v1501_v63 = vadd.f32 %v1500_v57, %v1490_v49 }
0x1124   :  { %v3204_v51 = vpop.f32.mrf.mxu0 }
0x1125   :  { %v3950_v52 = vpack.c.bf16 %v1513_v50, %v1513_v50  ;;  %v3963_v59 = vpack.c.bf16 %v1501_v63, %v1501_v63 }
0x1126   :  { %v1493_v35 = vpop.f32.mrf.mxu0 }
0x1127   :  { %v1514_v54 = vadd.f32 %v1511_v48, %v1493_v35  ;;  %1530 = vrot.lane.b32.xlu1 %v3950_v52, %s3552_s21  ;;  %v1502_v31 = vadd.f32 %v1500_v57, %v1493_v35 }
0x1128   :  { %v3205_v55 = vpop.f32.mrf.mxu0 }
0x1129   :  { %v3954_v56 = vpack.c.bf16 %v1514_v54, %v1514_v54  ;;  %v3970_v37 = vpack.c.bf16 %v1502_v31, %v1502_v31 }
0x112b   :  { %1579 = vrot.lane.b32.xlu1 %v3954_v56, %s3552_s21 }
0x1199   :  { %v1531_v58 = vpop.permute.xlu1 %1530 }
0x119a   :  { %v1536_v62 = vsel %vm232_vm3, %v1531_v58, 0 }
0x119b   :  { %3207 = vmatpush3.bf16.xpose.msra.mxu1 %v1536_v62 }
0x119c   :  { %3218 = vmatprep.subr.bf16.mxu1 %v3549_v0 }
0x119d   :  { %v1580_v1 = vpop.permute.xlu1 %1579 }
0x119e   :  { %v1585_v2 = vsel %vm232_vm3, %v1580_v1, 0 }
0x119f   :  { %3213 = vmatpush3.bf16.xpose.msra.mxu0 %v1585_v2 }
0x11a0   :  { %3224 = vmatprep.subr.bf16.mxu0 %v3549_v0 }
0x11a2   :  { %3209 = vmatmul.mubr.msk.bf16.vlgmr.msra.gmra.mxu1 %vm232_vm3, %v3963_v59 }
0x11a3   :  { %3220 = vmatprep.mubr.msk.bf16.mxu1 %vm3550_vm0, %v3549_v0 }
0x11a6   :  { %3215 = vmatmul.mubr.msk.bf16.vlgmr.msra.gmra.mxu0 %vm232_vm3, %v3970_v37 }
0x11a7   :  { %3226 = vmatprep.mubr.msk.bf16.mxu0 %vm3550_vm0, %v3549_v0 }
0x1262   :  { %v1572_v39 = vpop.f32.mrf.mxu1 }
0x1263   :  { %v1627_v3 = vsel %vm232_vm3, %v1572_v39, -inf }
0x1264   :  { %1628 = vmax.xlane.f32.xlu0 %v1627_v3  ;;  %v3210_v28 = vpop.f32.mrf.mxu1 }
0x1266   :  { %v1575_v17 = vpop.f32.mrf.mxu1  ;;  %v1621_v21 = vpop.f32.mrf.mxu0 }
0x1267   :  { %v1630_v32 = vsel %vm232_vm3, %v1621_v21, -inf }
0x1268   :  { %v3211_v4 = vpop.f32.mrf.mxu1  ;;  %1631 = vmax.xlane.f32.xlu1 %v1630_v32  ;;  %v3216_v19 = vpop.f32.mrf.mxu0 }
0x126a   :  { %v1624_v22 = vpop.f32.mrf.mxu0 }
0x126c   :  { %v3217_v11 = vpop.f32.mrf.mxu0 }
0x127a   :  { %1522 = vrot.lane.b32.xlu0 %v1520_v42, %s3553_s22 }
0x12ed   :  { %v1629_v5 = vpop.xlane.xlu0 %1628 }
0x12ee   :  { %v1633_v6 = vsub.f32 %v1572_v39, %v1629_v5 }
0x12f0   :  { %v1635_v7 = vmul.f32 1.442695, %v1633_v6 }
0x12f1   :  { %v1523_v8 = vpop.permute.xlu0 %1522  ;;  %v1632_v9 = vpop.xlane.xlu1 %1631 }
0x12f2   :  { %3450 = vpow2.f32 %v1635_v7  ;;  %v1526_v14 = vadd.f32 %v1523_v8, %v1493_v35  ;;  %v1634_v15 = vsub.f32 %v1621_v21, %v1632_v9  ;;  %v1525_v25 = vadd.f32 %v1523_v8, %v1490_v49 }
0x12f4   :  { %v3982_v18 = vpack.c.bf16 %v1526_v14, %v1526_v14  ;;  %v1637_v40 = vmul.f32 1.442695, %v1634_v15  ;;  %v3994_v26 = vpack.c.bf16 %v1525_v25, %v1525_v25 }
0x12f6   :  { %3452 = vpow2.f32 %v1637_v40  ;;  %1701 = vrot.lane.b32.xlu0 %v3982_v18, %s3553_s22 }
0x12fa   :  { %1752 = vrot.lane.b32.xlu0 %v3950_v52, %s3554_s23 }
0x12fe   :  { %1803 = vrot.lane.b32.xlu0 %v3954_v56, %s3554_s23 }
0x12ff   :  { %v3451_v53 = vpop.eup %3450 }
0x1300   :  { %v1639_v20 = vsel %vm232_vm3, %v3451_v53, 0.0 }
0x1301   :  { %1640 = vadd.xlane.f32.xlu1 %v1639_v20 }
0x1302   :  { %1801 = vrot.lane.b32.xlu0 %v3970_v37, %s3555_s24 }
0x1303   :  { %v3453_v23 = vpop.eup %3452 }
0x1304   :  { %v1642_v24 = vsel %vm232_vm3, %v3453_v23, 0.0 }
0x1305   :  { %1643 = vadd.xlane.f32.xlu1 %v1642_v24 }
0x1316   :  { %1652 = vrot.lane.b32.xlu1 %v3994_v26, %s3553_s22 }
0x131a   :  { %1750 = vrot.lane.b32.xlu1 %v3963_v59, %s3555_s24 }
0x1368   :  { %v1702_v27 = vpop.permute.xlu0 %1701 }
0x1369   :  { %v1707_v29 = vsel %vm358_vm4, %v1702_v27, 0 }
0x136a   :  { %3225 = vmatpush3.bf16.msra.mxu0 %v1707_v29 }
0x136b   :  { %3236 = vmatprep.subr.bf16.mxu0 %v3549_v0 }
0x136c   :  { %v1753_v47 = vpop.permute.xlu0 %1752 }
0x136d   :  { %v1758_v51 = vsel %vm232_vm3, %v1753_v47, 0 }
0x1370   :  { %v1804_v54 = vpop.permute.xlu0 %1803 }
0x1371   :  { %v1809_v57 = vsel %vm232_vm3, %v1804_v54, 0 }
0x1374   :  { %v1802_v62 = vpop.permute.xlu0 %1801 }
0x138a   :  { %v1641_v30 = vpop.xlane.xlu1 %1640 }
0x138b   :  { %3454 = vrcp.f32 %v1641_v30 }
0x138e   :  { %v1644_v36 = vpop.xlane.xlu1 %1643 }
0x138f   :  { %3456 = vrcp.f32 %v1644_v36 }
0x1392   :  { %v1653_v41 = vpop.permute.xlu1 %1652 }
0x1393   :  { %v1658_v43 = vsel %vm358_vm4, %v1653_v41, 0 }
0x1394   :  { %3219 = vmatpush3.bf16.msra.mxu1 %v1658_v43 }
0x1395   :  { %3230 = vmatprep.subr.bf16.mxu1 %v3549_v0 }
0x1396   :  { %v1751_v58 = vpop.permute.xlu1 %1750 }
0x1398   :  { %v3455_v44 = vpop.eup %3454 }
0x1399   :  { %v1647_v48 = vmul.f32 %v3455_v44, %v3451_v53 }
0x139b   :  { %v1649_v49 = vpack.c.bf16 %v1647_v48, %v1647_v48 }
0x139c   :  { %v3457_v50 = vpop.eup %3456 }
0x139d   :  { %3221 = vmatmul.mubr.msk.bf16.vlgmr.msra.gmra.mxu1 %vm232_vm3, %v1649_v49  ;;  %v1648_v35 = vmul.f32 %v3457_v50, %v3453_v23 }
0x139e   :  { %3231 = vmatpush3.bf16.xpose.msra.mxu1 %v1758_v51  ;;  %3232 = vmatprep.mubr.msk.bf16.mxu1 %vm3550_vm0, %v3549_v0 }
0x139f   :  { %v1650_v55 = vpack.c.bf16 %v1648_v35, %v1648_v35  ;;  %3242 = vmatprep.subr.bf16.mxu1 %v3549_v0 }
0x13a1   :  { %3227 = vmatmul.mubr.msk.bf16.vlgmr.msra.gmra.mxu0 %vm232_vm3, %v1650_v55 }
0x13a2   :  { %3237 = vmatpush3.bf16.xpose.msra.mxu0 %v1809_v57  ;;  %3238 = vmatprep.mubr.msk.bf16.mxu0 %vm3550_vm0, %v3549_v0 }
0x13a3   :  { %3248 = vmatprep.subr.bf16.mxu0 %v3549_v0 }
0x13a5   :  { %3233 = vmatmul.mubr.msk.bf16.vlgmr.msra.gmra.mxu1 %vm232_vm3, %v1751_v58 }
0x13a6   :  { %3244 = vmatprep.mubr.msk.bf16.mxu1 %vm3550_vm0, %v3549_v0 }
0x13a9   :  { %3239 = vmatmul.mubr.msk.bf16.vlgmr.msra.gmra.mxu0 %vm232_vm3, %v1802_v62 }
0x13aa   :  { %3250 = vmatprep.mubr.msk.bf16.mxu0 %vm3550_vm0, %v3549_v0 }
0x145d   :  { %v4020_v63 = vpop.f32.mrf.mxu1 }
0x145f   :  { %v3222_v1 = vpop.f32.mrf.mxu1 }
0x1461   :  { %v1697_v2 = vpop.f32.mrf.mxu1  ;;  %v4022_v31 = vpop.f32.mrf.mxu0 }
0x1463   :  { %v3223_v39 = vpop.f32.mrf.mxu1  ;;  %v3228_v3 = vpop.f32.mrf.mxu0 }
0x1465   :  { %v1746_v28 = vpop.f32.mrf.mxu0  ;;  %v1794_v17 = vpop.f32.mrf.mxu1 }
0x1466   :  { %v1851_v21 = vsel %vm232_vm3, %v1794_v17, -inf }
0x1467   :  { %1852 = vmax.xlane.f32.xlu1 %v1851_v21  ;;  %v3229_v32 = vpop.f32.mrf.mxu0  ;;  %v3234_v4 = vpop.f32.mrf.mxu1 }
0x1469   :  { %v1797_v19 = vpop.f32.mrf.mxu1  ;;  %v1845_v22 = vpop.f32.mrf.mxu0 }
0x146a   :  { %v1854_v11 = vsel %vm232_vm3, %v1845_v22, -inf }
0x146b   :  { %v3235_v42 = vpop.f32.mrf.mxu1  ;;  %1855 = vmax.xlane.f32.xlu0 %v1854_v11  ;;  %v3240_v5 = vpop.f32.mrf.mxu0 }
0x146d   :  { %v1848_v6 = vpop.f32.mrf.mxu0 }
0x146f   :  { %v3241_v7 = vpop.f32.mrf.mxu0 }
0x1478   :  { %1923 = vrot.lane.b32.xlu1 %v3982_v18, %s3556_s25 }
0x1481   :  { %1875 = vrot.lane.b32.xlu0 %v3994_v26, %s3556_s25 }
0x14f0   :  { %v1853_v8 = vpop.xlane.xlu1 %1852 }
0x14f1   :  { %v1857_v9 = vsub.f32 %v1794_v17, %v1853_v8 }
0x14f3   :  { %v1859_v14 = vmul.f32 1.442695, %v1857_v9 }
0x14f4   :  { %v1924_v15 = vpop.permute.xlu1 %1923  ;;  %v1856_v40 = vpop.xlane.xlu0 %1855 }
0x14f5   :  { %3458 = vpow2.f32 %v1859_v14  ;;  %v1929_v53 = vsel %vm358_vm4, %v1924_v15, 0  ;;  %v1858_v20 = vsub.f32 %v1845_v22, %v1856_v40 }
0x14f6   :  { %3249 = vmatpush3.bf16.msra.mxu0 %v1929_v53 }
0x14f7   :  { %v1861_v23 = vmul.f32 1.442695, %v1858_v20  ;;  %3260 = vmatprep.subr.bf16.mxu0 %v3549_v0 }
0x14f8   :  { %v1876_v24 = vpop.permute.xlu0 %1875 }
0x14f9   :  { %3460 = vpow2.f32 %v1861_v23  ;;  %v1881_v25 = vsel %vm358_vm4, %v1876_v24, 0 }
0x14fa   :  { %3243 = vmatpush3.bf16.msra.mxu1 %v1881_v25 }
0x14fb   :  { %3254 = vmatprep.subr.bf16.mxu1 %v3549_v0 }
0x1502   :  { %v3459_v27 = vpop.eup %3458 }
0x1503   :  { %v1863_v29 = vsel %vm232_vm3, %v3459_v27, 0.0 }
0x1504   :  { %1864 = vadd.xlane.f32.xlu0 %v1863_v29 }
0x1506   :  { %v3461_v30 = vpop.eup %3460 }
0x1507   :  { %v1866_v36 = vsel %vm232_vm3, %v3461_v30, 0.0 }
0x1508   :  { %1867 = vadd.xlane.f32.xlu1 %v1866_v36 }
0x1519   :  { %1973 = vrot.lane.b32.xlu1 %v3950_v52, %s3557_s26 }
0x151a   :  { %2023 = vrot.lane.b32.xlu0 %v3954_v56, %s3557_s26 }
0x151d   :  { %1971 = vrot.lane.b32.xlu1 %v3963_v59, %s3558_s27 }
0x151e   :  { %2021 = vrot.lane.b32.xlu0 %v3970_v37, %s3558_s27 }
0x158d   :  { %v1865_v41 = vpop.xlane.xlu0 %1864 }
0x158e   :  { %3462 = vrcp.f32 %v1865_v41 }
0x1591   :  { %v1868_v43 = vpop.xlane.xlu1 %1867  ;;  %v2024_v54 = vpop.permute.xlu0 %2023 }
0x1592   :  { %3464 = vrcp.f32 %v1868_v43  ;;  %v2029_v57 = vsel %vm232_vm3, %v2024_v54, 0 }
0x1595   :  { %v1974_v48 = vpop.permute.xlu1 %1973  ;;  %v2022_v62 = vpop.permute.xlu0 %2021 }
0x1596   :  { %v1979_v51 = vsel %vm232_vm3, %v1974_v48, 0 }
0x1599   :  { %v1972_v58 = vpop.permute.xlu1 %1971 }
0x159b   :  { %v3463_v44 = vpop.eup %3462 }
0x159c   :  { %v1871_v47 = vmul.f32 %v3463_v44, %v3459_v27 }
0x159e   :  { %v1873_v49 = vpack.c.bf16 %v1871_v47, %v1871_v47 }
0x159f   :  { %v3465_v50 = vpop.eup %3464 }
0x15a0   :  { %3245 = vmatmul.mubr.msk.bf16.vlgmr.msra.gmra.mxu1 %vm232_vm3, %v1873_v49  ;;  %v1872_v35 = vmul.f32 %v3465_v50, %v3461_v30 }
0x15a1   :  { %3255 = vmatpush3.bf16.xpose.msra.mxu1 %v1979_v51  ;;  %3256 = vmatprep.mubr.msk.bf16.mxu1 %vm3550_vm0, %v3549_v0 }
0x15a2   :  { %v1874_v55 = vpack.c.bf16 %v1872_v35, %v1872_v35  ;;  %3266 = vmatprep.subr.bf16.mxu1 %v3549_v0 }
0x15a4   :  { %3251 = vmatmul.mubr.msk.bf16.vlgmr.msra.gmra.mxu0 %vm232_vm3, %v1874_v55 }
0x15a5   :  { %3261 = vmatpush3.bf16.xpose.msra.mxu0 %v2029_v57  ;;  %3262 = vmatprep.mubr.msk.bf16.mxu0 %vm3550_vm0, %v3549_v0 }
0x15a6   :  { %3272 = vmatprep.subr.bf16.mxu0 %v3549_v0 }
0x15a8   :  { %3257 = vmatmul.mubr.msk.bf16.vlgmr.msra.gmra.mxu1 %vm232_vm3, %v1972_v58 }
0x15a9   :  { %3268 = vmatprep.mubr.msk.bf16.mxu1 %vm3550_vm0, %v3549_v0 }
0x15ac   :  { %3263 = vmatmul.mubr.msk.bf16.vlgmr.msra.gmra.mxu0 %vm232_vm3, %v2022_v62 }
0x15ad   :  { %3274 = vmatprep.mubr.msk.bf16.mxu0 %vm3550_vm0, %v3549_v0 }
0x1660   :  { %v4060_v1 = vpop.f32.mrf.mxu1 }
0x1662   :  { %v3246_v2 = vpop.f32.mrf.mxu1 }
0x1664   :  { %v1920_v39 = vpop.f32.mrf.mxu1  ;;  %v4062_v3 = vpop.f32.mrf.mxu0 }
0x1665   :  { %v3372_v28 = vpack.i.bf16 %v4062_v3, %v4060_v1 }
0x1666   :  { %v3247_v17 = vpop.f32.mrf.mxu1  ;;  %v3252_v21 = vpop.f32.mrf.mxu0 }
0x1668   :  { %v1968_v32 = vpop.f32.mrf.mxu0  ;;  %v2015_v4 = vpop.f32.mrf.mxu1 }
0x1669   :  { %v2071_v19 = vsel %vm232_vm3, %v2015_v4, -inf }
0x166a   :  { %2072 = vmax.xlane.f32.xlu1 %v2071_v19  ;;  %v3253_v22 = vpop.f32.mrf.mxu0  ;;  %v3258_v11 = vpop.f32.mrf.mxu1 }
0x166c   :  { %v2018_v42 = vpop.f32.mrf.mxu1  ;;  %v2065_v5 = vpop.f32.mrf.mxu0 }
0x166d   :  { %v2074_v6 = vsel %vm232_vm3, %v2065_v5, -inf }
0x166e   :  { %v3259_v7 = vpop.f32.mrf.mxu1  ;;  %2075 = vmax.xlane.f32.xlu0 %v2074_v6  ;;  %v3264_v8 = vpop.f32.mrf.mxu0 }
0x1670   :  { %v2068_v9 = vpop.f32.mrf.mxu0 }
0x1672   :  { %v3265_v14 = vpop.f32.mrf.mxu0 }
0x167b   :  { %2143 = vrot.lane.b32.xlu1 %v3982_v18, %s3559_s29 }
0x1684   :  { %2095 = vrot.lane.b32.xlu0 %v3994_v26, %s3559_s29 }
0x16f3   :  { %v2073_v15 = vpop.xlane.xlu1 %2072 }
0x16f4   :  { %v2077_v40 = vsub.f32 %v2015_v4, %v2073_v15 }
0x16f6   :  { %v2079_v53 = vmul.f32 1.442695, %v2077_v40 }
0x16f7   :  { %v2144_v20 = vpop.permute.xlu1 %2143  ;;  %v2076_v23 = vpop.xlane.xlu0 %2075 }
0x16f8   :  { %3466 = vpow2.f32 %v2079_v53  ;;  %v2149_v24 = vsel %vm358_vm4, %v2144_v20, 0  ;;  %v2078_v25 = vsub.f32 %v2065_v5, %v2076_v23 }
0x16f9   :  { %3273 = vmatpush3.bf16.msra.mxu0 %v2149_v24 }
0x16fa   :  { %v2081_v27 = vmul.f32 1.442695, %v2078_v25  ;;  %3284 = vmatprep.subr.bf16.mxu0 %v3549_v0 }
0x16fb   :  { %v2096_v29 = vpop.permute.xlu0 %2095 }
0x16fc   :  { %3468 = vpow2.f32 %v2081_v27  ;;  %v2101_v30 = vsel %vm358_vm4, %v2096_v29, 0 }
0x16fd   :  { %3267 = vmatpush3.bf16.msra.mxu1 %v2101_v30 }
0x16fe   :  { %3278 = vmatprep.subr.bf16.mxu1 %v3549_v0 }
0x1705   :  { %v3467_v36 = vpop.eup %3466 }
0x1706   :  { %v2083_v41 = vsel %vm232_vm3, %v3467_v36, 0.0 }
0x1707   :  { %2084 = vadd.xlane.f32.xlu0 %v2083_v41 }
0x1709   :  { %v3469_v43 = vpop.eup %3468 }
0x170a   :  { %v2086_v44 = vsel %vm232_vm3, %v3469_v43, 0.0 }
0x170b   :  { %2087 = vadd.xlane.f32.xlu1 %v2086_v44 }
0x171c   :  { %2193 = vrot.lane.b32.xlu1 %v3950_v52, %s3560_s30 }
0x171d   :  { %2243 = vrot.lane.b32.xlu0 %v3954_v56, %s3560_s30 }
0x1720   :  { %2191 = vrot.lane.b32.xlu1 %v3963_v59, %s3561_s8 }
0x1721   :  { %2241 = vrot.lane.b32.xlu0 %v3970_v37, %s3561_s8 }
0x1790   :  { %v2085_v47 = vpop.xlane.xlu0 %2084 }
0x1791   :  { %3470 = vrcp.f32 %v2085_v47 }
0x1794   :  { %v2088_v48 = vpop.xlane.xlu1 %2087  ;;  %v2244_v55 = vpop.permute.xlu0 %2243 }
0x1795   :  { %3472 = vrcp.f32 %v2088_v48  ;;  %v2249_v37 = vsel %vm232_vm3, %v2244_v55, 0 }
0x1798   :  { %v2194_v51 = vpop.permute.xlu1 %2193  ;;  %v2242_v58 = vpop.permute.xlu0 %2241 }
0x1799   :  { %v2199_v52 = vsel %vm232_vm3, %v2194_v51, 0 }
0x179c   :  { %v2192_v57 = vpop.permute.xlu1 %2191 }
0x179e   :  { %v3471_v49 = vpop.eup %3470 }
0x179f   :  { %v2091_v50 = vmul.f32 %v3471_v49, %v3467_v36 }
0x17a1   :  { %v2093_v35 = vpack.c.bf16 %v2091_v50, %v2091_v50 }
0x17a2   :  { %v3473_v54 = vpop.eup %3472 }
0x17a3   :  { %3269 = vmatmul.mubr.msk.bf16.vlgmr.msra.gmra.mxu1 %vm232_vm3, %v2093_v35  ;;  %v2092_v56 = vmul.f32 %v3473_v54, %v3469_v43  ;;  %v3400_v35 = vld [vmem:[%s4231_s3 + $0x38] sm:$0xff]   ;;  %v3401_v54 = vld [vmem:[%s4231_s3 + $0x30] sm:$0xff]  }
0x17a4   :  { %3279 = vmatpush3.bf16.xpose.msra.mxu1 %v2199_v52  ;;  %3280 = vmatprep.mubr.msk.bf16.mxu1 %vm3550_vm0, %v3549_v0 }
0x17a5   :  { %v2094_v59 = vpack.c.bf16 %v2092_v56, %v2092_v56  ;;  %3290 = vmatprep.subr.bf16.mxu1 %v3549_v0 }
0x17a7   :  { %3275 = vmatmul.mubr.msk.bf16.vlgmr.msra.gmra.mxu0 %vm232_vm3, %v2094_v59 }
0x17a8   :  { %3285 = vmatpush3.bf16.xpose.msra.mxu0 %v2249_v37  ;;  %3286 = vmatprep.mubr.msk.bf16.mxu0 %vm3550_vm0, %v3549_v0 }
0x17a9   :  { %3296 = vmatprep.subr.bf16.mxu0 %v3549_v0 }
0x17ab   :  { %3281 = vmatmul.mubr.msk.bf16.vlgmr.msra.gmra.mxu1 %vm232_vm3, %v2192_v57 }
0x17ac   :  { %3292 = vmatprep.mubr.msk.bf16.mxu1 %vm3550_vm0, %v3549_v0 }
0x17af   :  { %3287 = vmatmul.mubr.msk.bf16.vlgmr.msra.gmra.mxu0 %vm232_vm3, %v2242_v58 }
0x17b0   :  { %3298 = vmatprep.mubr.msk.bf16.mxu0 %vm3550_vm0, %v3549_v0 }
0x1863   :  { %v2137_v62 = vpop.f32.mrf.mxu1 }
0x1865   :  { %v3270_v2 = vpop.f32.mrf.mxu1 }
0x1867   :  { %v2140_v39 = vpop.f32.mrf.mxu1  ;;  %v2185_v17 = vpop.f32.mrf.mxu0 }
0x1868   :  { %v3377_v21 = vpack.i.bf16 %v2185_v17, %v2137_v62 }
0x1869   :  { %v3271_v32 = vpop.f32.mrf.mxu1  ;;  %v3276_v4 = vpop.f32.mrf.mxu0 }
0x186b   :  { %v2188_v19 = vpop.f32.mrf.mxu0  ;;  %v2235_v22 = vpop.f32.mrf.mxu1 }
0x186c   :  { %v2291_v11 = vsel %vm232_vm3, %v2235_v22, -inf }
0x186d   :  { %2292 = vmax.xlane.f32.xlu1 %v2291_v11  ;;  %v3277_v42 = vpop.f32.mrf.mxu0  ;;  %v3282_v5 = vpop.f32.mrf.mxu1 }
0x186f   :  { %v2238_v6 = vpop.f32.mrf.mxu1  ;;  %v2285_v7 = vpop.f32.mrf.mxu0 }
0x1870   :  { %v2294_v8 = vsel %vm232_vm3, %v2285_v7, -inf }
0x1871   :  { %v3283_v9 = vpop.f32.mrf.mxu1  ;;  %2295 = vmax.xlane.f32.xlu0 %v2294_v8  ;;  %v3288_v14 = vpop.f32.mrf.mxu0 }
0x1873   :  { %v2288_v15 = vpop.f32.mrf.mxu0 }
0x1875   :  { %v3289_v40 = vpop.f32.mrf.mxu0 }
0x18f6   :  { %v2293_v53 = vpop.xlane.xlu1 %2292 }
0x18f7   :  { %v2297_v20 = vsub.f32 %v2235_v22, %v2293_v53 }
0x18f9   :  { %v2299_v23 = vmul.f32 1.442695, %v2297_v20 }
0x18fa   :  { %v2296_v24 = vpop.xlane.xlu0 %2295 }
0x18fb   :  { %3474 = vpow2.f32 %v2299_v23  ;;  %v2298_v25 = vsub.f32 %v2285_v7, %v2296_v24 }
0x18fd   :  { %v2301_v27 = vmul.f32 1.442695, %v2298_v25 }
0x18ff   :  { %3476 = vpow2.f32 %v2301_v27 }
0x1908   :  { %v3475_v29 = vpop.eup %3474 }
0x1909   :  { %v2303_v30 = vsel %vm232_vm3, %v3475_v29, 0.0 }
0x190a   :  { %2304 = vadd.xlane.f32.xlu0 %v2303_v30 }
0x190c   :  { %v3477_v36 = vpop.eup %3476 }
0x190d   :  { %v2306_v41 = vsel %vm232_vm3, %v3477_v36, 0.0 }
0x190e   :  { %2307 = vadd.xlane.f32.xlu1 %v2306_v41 }
0x191f   :  { %2363 = vrot.lane.b32.xlu1 %v3982_v18, %s3562_s9 }
0x1920   :  { %2315 = vrot.lane.b32.xlu0 %v3994_v26, %s3562_s9 }
0x1923   :  { %3373 = vrot.lane.b32.xlu1 %v3372_v28, %s3548_s28  ;;  %s2870_s28 = sshll.u32 %s3565_s19, 4  ;;  %s2871_s28 = int_to_ptr.vmem [resolvable:$true] %s2870_s28 }
0x1924   :  { %3378 = vrot.lane.b32.xlu0 %v3377_v21, %s3563_s0  ;;  %s3522_s18 = scalar_lea.vmem %s2871_s28, 32  ;;  %p3527_p6 = scmp.lt.s32.totalorder %s2871_s28, %s2871_s28 }
0x1925   :  { %p3523_p5 = scmp.ne.s32.totalorder %s2871_s28, %s3522_s18  ;;  %p3528_p7 = scmp.lt.s32.totalorder %s3522_s18, %s3522_s18 }
0x1927   :  { %p3529_p8 = por %p3528_p7, %p3527_p6 }
0x1929   :  { %p3530_p9 = pnand %p3529_p8, %p3523_p5 }
0x1993   :  { %v2305_v43 = vpop.xlane.xlu0 %2304 }
0x1994   :  { %3478 = vrcp.f32 %v2305_v43 }
0x1997   :  { %v2308_v44 = vpop.xlane.xlu1 %2307  ;;  %v2316_v47 = vpop.permute.xlu0 %2315 }
0x1998   :  { %3480 = vrcp.f32 %v2308_v44  ;;  %v2321_v48 = vsel %vm358_vm4, %v2316_v47, 0 }
0x1999   :  { %3291 = vmatpush3.bf16.msra.mxu1 %v2321_v48 }
0x199a   :  { %3302 = vmatprep.subr.bf16.mxu1 %v3549_v0 }
0x199b   :  { %v2364_v18 = vpop.permute.xlu1 %2363  ;;  %v3379_v32 = vpop.permute.xlu0 %3378 }
0x199c   :  { %v2369_v26 = vsel %vm358_vm4, %v2364_v18, 0  ;;  %v3381_v22 = vunpack.i.h.bf16 %v3379_v32  ;;  %v3380_v11 = vunpack.i.l.bf16 %v3379_v32 }
0x199d   :  { %3297 = vmatpush3.bf16.msra.mxu0 %v2369_v26 }
0x199e   :  { %3310 = vmatprep.subr.bf16.mxu0 %v3549_v0 }
0x199f   :  { %v3374_v39 = vpop.permute.xlu1 %3373 }
0x19a0   :  { %v3376_v17 = vunpack.i.h.bf16 %v3374_v39  ;;  %v3375_v21 = vunpack.i.l.bf16 %v3374_v39 }
0x19a1   :  { %v3479_v1 = vpop.eup %3478 }
0x19a2   :  { %v2311_v3 = vmul.f32 %v3479_v1, %v3475_v29  ;;  %v2436_v4 = vsel %vm232_vm3, %v4022_v31, %v3376_v17  ;;  %v2435_v19 = vsel %vm232_vm3, %v4020_v63, %v3375_v21  ;;  %v2445_v63 = vrot.slane %v3931_v13, %v1148_v38  ;;  %v3403_v1 = vld [vmem:[%s4231_s3 + $0x40] sm:$0xff]  }
0x19a3   :  { %v2437_v7 = vsel %vm1139_vm5, %v2435_v19, %v3380_v11  ;;  %v2438_v8 = vsel %vm1139_vm5, %v2436_v4, %v3381_v22  ;;  %v2546_v17 = vrot.slane %v3931_v13, %v1250_v34  ;;  %v2617_v34 = vrot.slane %v3931_v13, %v1321_v61 }
0x19a4   :  { %v2313_v28 = vpack.c.bf16 %v2311_v3, %v2311_v3 }
0x19a5   :  { %v3481_v49 = vpop.eup %3480 }
0x19a6   :  { %3293 = vmatmul.mubr.msk.bf16.vlgmr.msra.gmra.mxu1 %vm232_vm3, %v2313_v28  ;;  %v2312_v50 = vmul.f32 %v3481_v49, %v3477_v36 }
0x19a7   :  { %3306 = vmatprep.mubr.msk.bf16.mxu1 %vm3550_vm0, %v3549_v0  ;;  %3303 = vmatpush3.bf16.msra.mxu1 %v3400_v35 }
0x19a8   :  { %v2314_v51 = vpack.c.bf16 %v2312_v50, %v2312_v50  ;;  %3304 = vmatprep.subr.bf16.mxu1 %v3549_v0 }
0x19aa   :  { %3299 = vmatmul.mubr.msk.bf16.vlgmr.msra.gmra.mxu0 %vm232_vm3, %v2314_v51 }
0x19ab   :  { %3314 = vmatprep.mubr.msk.bf16.mxu0 %vm3550_vm0, %v3549_v0  ;;  %3305 = vmatpush3.bf16.msra.mxu1 %v3401_v54 }
0x19ac   :  { %3318 = vmatprep.subr.bf16.mxu1 %v3549_v0 }
0x1a66   :  { %v2357_v52 = vpop.f32.mrf.mxu1 }
0x1a68   :  { %v3294_v56 = vpop.f32.mrf.mxu1 }
0x1a69   :  { %v2533_v56 = vrot.slane %v3931_v13, %v1237_v60  ;;  %v3404_v60 = vld [vmem:[%s4231_s3 + $0x58] sm:$0xff]  }
0x1a6a   :  { %v2360_v55 = vpop.f32.mrf.mxu1  ;;  %v2405_v59 = vpop.f32.mrf.mxu0 }
0x1a6b   :  { %v3382_v37 = vpack.i.bf16 %v2405_v59, %v2357_v52 }
0x1a6c   :  { %v3295_v57 = vpop.f32.mrf.mxu1  ;;  %v3300_v58 = vpop.f32.mrf.mxu0 }
0x1a6d   :  { %3383 = vrot.lane.b32.xlu1 %v3382_v37, %s3564_s14  ;;  %v2539_v57 = vrot.slane %v3931_v13, %v1243_v16  ;;  %v3405_v16 = vld [vmem:[%s4231_s3 + $0x50] sm:$0xff]  }
0x1a6e   :  { %v2408_v62 = vpop.f32.mrf.mxu0 }
0x1a70   :  { %v3301_v2 = vpop.f32.mrf.mxu0 }
0x1adf   :  { %v3384_v42 = vpop.permute.xlu1 %3383 }
0x1ae0   :  { %v3386_v5 = vunpack.i.h.bf16 %v3384_v42  ;;  %v3385_v6 = vunpack.i.l.bf16 %v3384_v42 }
0x1ae2   :  { %v2440_v9 = vsel %vm1142_vm6, %v2438_v8, %v3386_v5  ;;  %v2439_v14 = vsel %vm1142_vm6, %v2437_v7, %v3385_v6 }
0x1ae3   :  { %v2441_v15 = vpack.c.bf16 %v2440_v9, %v2439_v14 }
0x1ae5   :  { %3307 = vmatmul.mubr.msk.bf16.vlgmr.msra.gmra.mxu1 %vm152_vm2, %v2441_v15 }
0x1ae6   :  { %3322 = vmatprep.mubr.msk.bf16.mxu1 %vm3550_vm0, %v3549_v0  ;;  %3319 = vmatpush3.bf16.msra.mxu1 %v3404_v60 }
0x1ae7   :  { %3320 = vmatprep.subr.bf16.mxu1 %v3549_v0 }
0x1aea   :  { %3321 = vmatpush3.bf16.msra.mxu1 %v3405_v16 }
0x1ba5   :  { %v2495_v31 = vpop.f32.mrf.mxu1 }
0x1ba6   :  { %v2496_v40 = vadd.f32 %v2495_v31, %v2445_v63 }
0x1ba7   :  { %v3308_v53 = vpop.f32.mrf.mxu1 }
0x1ba8   :  { %v2502_v20 = vadd.f32 %v2496_v40, %v3941_v45 }
0x1ba9   :  { %v2498_v23 = vpop.f32.mrf.mxu1 }
0x1baa   :  { %v2499_v24 = vadd.f32 %v2498_v23, %v2445_v63  ;;  %v2504_v25 = vsel %vm152_vm2, %v2502_v20, 0.0 }
0x1bab   :  { %2505 = vadd.xlane.f32.xlu0 %v2504_v25  ;;  %v3309_v27 = vpop.f32.mrf.mxu1 }
0x1bac   :  { %v2503_v29 = vadd.f32 %v2499_v24, %v3943_v46  ;;  %v3402_v46 = vld [vmem:[%s4231_s3 + $0x48] sm:$0xff]  }
0x1bad   :  { %3311 = vmatpush3.bf16.msra.mxu0 %v3402_v46 }
0x1bae   :  { %v2507_v30 = vsel %vm152_vm2, %v2503_v29, 0.0  ;;  %3312 = vmatprep.subr.bf16.mxu0 %v3549_v0 }
0x1baf   :  { %2508 = vadd.xlane.f32.xlu1 %v2507_v30 }
0x1bb1   :  { %3313 = vmatpush3.bf16.msra.mxu0 %v3403_v1 }
0x1bb2   :  { %3326 = vmatprep.subr.mxu0 %v3549_v0 }
0x1c34   :  { %v2506_v36 = vpop.xlane.xlu0 %2505 }
0x1c35   :  { %v2510_v41 = vmul.f32 0.03125, %v2506_v36 }
0x1c37   :  { %v2512_v43 = vsub.f32 %v2502_v20, %v2510_v41 }
0x1c38   :  { %v2509_v38 = vpop.xlane.xlu1 %2508 }
0x1c39   :  { %v2511_v44 = vmul.f32 0.03125, %v2509_v38  ;;  %v2514_v47 = vmul.f32 %v2512_v43, %v2512_v43 }
0x1c3b   :  { %v2513_v48 = vsub.f32 %v2503_v29, %v2511_v44  ;;  %v2516_v45 = vsel %vm152_vm2, %v2514_v47, 0.0 }
0x1c3c   :  { %2517 = vadd.xlane.f32.xlu0 %v2516_v45 }
0x1c3d   :  { %v2515_v18 = vmul.f32 %v2513_v48, %v2513_v48 }
0x1c3f   :  { %v2519_v26 = vsel %vm152_vm2, %v2515_v18, 0.0 }
0x1c40   :  { %2520 = vadd.xlane.f32.xlu0 %v2519_v26 }
0x1cc5   :  { %v2518_v3 = vpop.xlane.xlu0 %2517 }
0x1cc6   :  { %v2522_v28 = vmul.f32 0.03125, %v2518_v3 }
0x1cc8   :  { %v2524_v49 = vadd.f32 1e-05, %v2522_v28 }
0x1cc9   :  { %v2521_v50 = vpop.xlane.xlu0 %2520 }
0x1cca   :  { %3482 = vrsqrt.f32 %v2524_v49  ;;  %v2523_v51 = vmul.f32 0.03125, %v2521_v50  ;;  %v2913_v50 = vld [vmem:[%s4232_s4 + $0x18] sm:$0x3] }
0x1ccc   :  { %v2525_v35 = vadd.f32 1e-05, %v2523_v51  ;;  %v2705_v51 = vrot.slane %v2913_v50, %v3676_v33 }
0x1cce   :  { %3484 = vrsqrt.f32 %v2525_v35 }
0x1cd7   :  { %v3483_v54 = vpop.eup %3482 }
0x1cd8   :  { %v2528_v52 = vmul.f32 %v3483_v54, %v2512_v43 }
0x1cda   :  { %v2534_v37 = vmul.f32 %v2533_v56, %v2528_v52  ;;  %v2711_v52 = vrot.slane %v2913_v50, %v3646_v12 }
0x1cdb   :  { %v3485_v55 = vpop.eup %3484 }
0x1cdc   :  { %v2529_v59 = vmul.f32 %v3485_v55, %v2513_v48  ;;  %v2540_v62 = vadd.f32 %v2539_v57, %v2534_v37 }
0x1cde   :  { %v2535_v58 = vmul.f32 %v2533_v56, %v2529_v59 }
0x1ce0   :  { %v2541_v2 = vadd.f32 %v2539_v57, %v2535_v58 }
0x1ce2   :  { %v2542_v39 = vpack.c.bf16 %v2541_v2, %v2540_v62 }
0x1ce4   :  { %3315 = vmatmul.mubr.msk.bf16.vlgmr.msra.gmra.mxu0 %vm152_vm2, %v2542_v39 }
0x1ce5   :  { %3334 = vmatprep.mubr.msk.f32.mxu0 %vm3550_vm0, %v3549_v0 }
0x1da4   :  { %v2596_v21 = vpop.f32.mrf.mxu0 }
0x1da5   :  { %v2597_v32 = vadd.f32 %v2596_v21, %v2546_v17 }
0x1da6   :  { %v3316_v4 = vpop.f32.mrf.mxu0 }
0x1da7   :  { %v2605_v19 = vmul.f32 0.70710677, %v2597_v32  ;;  %v2603_v9 = vmul.f32 0.5, %v2597_v32 }
0x1da8   :  { %v2599_v22 = vpop.f32.mrf.mxu0 }
0x1da9   :  { %3486 = verf.f32 %v2605_v19  ;;  %v2600_v11 = vadd.f32 %v2599_v22, %v2546_v17  ;;  %v2774_v22 = vld [vmem:[%s4234_s6 + $0x18] sm:$0xff] }
0x1daa   :  { %v3317_v42 = vpop.f32.mrf.mxu0  ;;  %3327 = vmatpush3.msra.mxu0 %v2774_v22 }
0x1dab   :  { %v2606_v5 = vmul.f32 0.70710677, %v2600_v11  ;;  %v2604_v14 = vmul.f32 0.5, %v2600_v11  ;;  %v2773_v11 = vld [vmem:[%s4234_s6 + $0x10] sm:$0xff]  ;;  %3328 = vmatprep.subr.mxu0 %v3549_v0  ;;  %v2772_v42 = vld [vmem:[%s4234_s6 + $0x8] sm:$0xff] }
0x1dac   :  { %3329 = vmatpush3.msra.mxu0 %v2773_v11 }
0x1dad   :  { %3488 = verf.f32 %v2606_v5  ;;  %3330 = vmatprep.subr.mxu0 %v3549_v0  ;;  %v2771_v5 = vld [vmem:[%s4234_s6] sm:$0xff] }
0x1dae   :  { %3331 = vmatpush3.msra.mxu0 %v2772_v42 }
0x1daf   :  { %3332 = vmatprep.subr.mxu0 %v3549_v0 }
0x1db0   :  { %3333 = vmatpush3.msra.mxu0 %v2771_v5 }
0x1db6   :  { %v3487_v6 = vpop.eup %3486 }
0x1db7   :  { %v2609_v7 = vadd.f32 1.0, %v3487_v6 }
0x1db9   :  { %v2611_v63 = vmul.f32 %v2609_v7, %v2603_v9 }
0x1dba   :  { %v3489_v8 = vpop.eup %3488 }
0x1dbb   :  { %v2610_v15 = vadd.f32 1.0, %v3489_v8 }
0x1dbd   :  { %v2612_v31 = vmul.f32 %v2610_v15, %v2604_v14 }
0x1dbf   :  { %v2613_v40 = vpack.c.bf16 %v2612_v31, %v2611_v63  ;;  %v2958_v31 = vld [vmem:[%s4233_s5 + $0x1] ss:$0 sm:$0xff] }
0x1dc1   :  { %3323 = vmatmul.mubr.msk.bf16.vlgmr.msra.gmra.mxu1 %vm152_vm2, %v2613_v40 }
0x1e81   :  { %v2667_v53 = vpop.f32.mrf.mxu1 }
0x1e82   :  { %v2668_v20 = vadd.f32 %v2667_v53, %v2617_v34 }
0x1e83   :  { %v3324_v23 = vpop.f32.mrf.mxu1 }
0x1e84   :  { %v2674_v24 = vadd.f32 %v2668_v20, %v2540_v62 }
0x1e85   :  { %v2670_v25 = vpop.f32.mrf.mxu1 }
0x1e86   :  { %v2671_v27 = vadd.f32 %v2670_v25, %v2617_v34  ;;  %v2676_v29 = vsel %vm152_vm2, %v2674_v24, 0.0  ;;  %v2959_v34 = vld [vmem:[%s4233_s5 + $0x2] ss:$0 sm:$0xff] }
0x1e87   :  { %2677 = vadd.xlane.f32.xlu1 %v2676_v29  ;;  %v3325_v30 = vpop.f32.mrf.mxu1 }
0x1e88   :  { %v2675_v36 = vadd.f32 %v2671_v27, %v2541_v2 }
0x1e8a   :  { %v2679_v41 = vsel %vm152_vm2, %v2675_v36, 0.0 }
0x1e8b   :  { %2680 = vadd.xlane.f32.xlu0 %v2679_v41 }
0x1f10   :  { %v2678_v43 = vpop.xlane.xlu1 %2677 }
0x1f11   :  { %v2682_v38 = vmul.f32 0.03125, %v2678_v43 }
0x1f13   :  { %v2684_v44 = vsub.f32 %v2674_v24, %v2682_v38 }
0x1f14   :  { %v2681_v10 = vpop.xlane.xlu0 %2680 }
0x1f15   :  { %v2683_v47 = vmul.f32 0.03125, %v2681_v10  ;;  %v2686_v61 = vmul.f32 %v2684_v44, %v2684_v44 }
0x1f17   :  { %v2685_v13 = vsub.f32 %v2675_v36, %v2683_v47  ;;  %v2688_v48 = vsel %vm152_vm2, %v2686_v61, 0.0 }
0x1f18   :  { %2689 = vadd.xlane.f32.xlu1 %v2688_v48 }
0x1f19   :  { %v2687_v45 = vmul.f32 %v2685_v13, %v2685_v13 }
0x1f1b   :  { %v2691_v18 = vsel %vm152_vm2, %v2687_v45, 0.0 }
0x1f1c   :  { %2692 = vadd.xlane.f32.xlu0 %v2691_v18 }
0x1fa1   :  { %v2690_v26 = vpop.xlane.xlu1 %2689 }
0x1fa2   :  { %v2694_v46 = vmul.f32 0.03125, %v2690_v26 }
0x1fa4   :  { %v2696_v1 = vadd.f32 1e-05, %v2694_v46 }
0x1fa5   :  { %v2693_v3 = vpop.xlane.xlu0 %2692 }
0x1fa6   :  { %3490 = vrsqrt.f32 %v2696_v1  ;;  %v2695_v28 = vmul.f32 0.03125, %v2693_v3  ;;  %v2960_v1 = vld [vmem:[%s4234_s6 + $0x20] ss:$0 sm:$0xff] }
0x1fa8   :  { %v2697_v49 = vadd.f32 1e-05, %v2695_v28 }
0x1faa   :  { %3492 = vrsqrt.f32 %v2697_v49 }
0x1fb3   :  { %v3491_v35 = vpop.eup %3490 }
0x1fb4   :  { %v2700_v54 = vmul.f32 %v3491_v35, %v2684_v44 }
0x1fb6   :  { %v2706_v56 = vmul.f32 %v2705_v51, %v2700_v54 }
0x1fb7   :  { %v3493_v55 = vpop.eup %3492 }
0x1fb8   :  { %v2712_v59 = vadd.f32 %v2711_v52, %v2706_v56  ;;  %v2701_v37 = vmul.f32 %v3493_v55, %v2685_v13 }
0x1fba   :  { %v2716_v57 = vsel %vm152_vm2, %v2712_v59, 0.0  ;;  %v2707_v58 = vmul.f32 %v2705_v51, %v2701_v37 }
0x1fbb   :  { %2717 = vadd.xlane.f32.xlu1 %v2716_v57 }
0x1fbc   :  { %v2713_v62 = vadd.f32 %v2711_v52, %v2707_v58 }
0x1fbe   :  { %v2719_v2 = vsel %vm152_vm2, %v2713_v62, 0.0 }
0x1fbf   :  { %2720 = vadd.xlane.f32.xlu0 %v2719_v2 }
0x2044   :  { %v2718_v39 = vpop.xlane.xlu1 %2717 }
0x2045   :  { %v2722_v60 = vmul.f32 0.03125, %v2718_v39 }
0x2047   :  { %v2724_v16 = vsub.f32 %v2712_v59, %v2722_v60 }
0x2048   :  { %v2721_v33 = vpop.xlane.xlu0 %2720 }
0x2049   :  { %v2723_v17 = vmul.f32 0.03125, %v2721_v33  ;;  %v2726_v21 = vmul.f32 %v2724_v16, %v2724_v16 }
0x204b   :  { %v2725_v32 = vsub.f32 %v2713_v62, %v2723_v17  ;;  %v2728_v12 = vsel %vm152_vm2, %v2726_v21, 0.0 }
0x204c   :  { %2729 = vadd.xlane.f32.xlu1 %v2728_v12 }
0x204d   :  { %v2727_v4 = vmul.f32 %v2725_v32, %v2725_v32 }
0x204f   :  { %v2731_v19 = vsel %vm152_vm2, %v2727_v4, 0.0 }
0x2050   :  { %2732 = vadd.xlane.f32.xlu0 %v2731_v19 }
0x20d5   :  { %v2730_v6 = vpop.xlane.xlu1 %2729 }
0x20d6   :  { %v2734_v7 = vmul.f32 0.03125, %v2730_v6 }
0x20d8   :  { %v2736_v8 = vadd.f32 1e-05, %v2734_v7 }
0x20d9   :  { %v2733_v9 = vpop.xlane.xlu0 %2732 }
0x20da   :  { %3494 = vrsqrt.f32 %v2736_v8  ;;  %v2735_v14 = vmul.f32 0.03125, %v2733_v9 }
0x20dc   :  { %v2737_v15 = vadd.f32 1e-05, %v2735_v14 }
0x20de   :  { %3496 = vrsqrt.f32 %v2737_v15 }
0x20e7   :  { %v3495_v63 = vpop.eup %3494 }
0x20e8   :  { %v2740_v40 = vmul.f32 %v3495_v63, %v2724_v16 }
0x20ea   :  { %v2746_v0 = vmul.f32 %v2958_v31, %v2740_v40 }
0x20eb   :  { %v3497_v53 = vpop.eup %3496 }
0x20ec   :  { %v2741_v20 = vmul.f32 %v3497_v53, %v2725_v32  ;;  %v2752_v23 = vadd.f32 %v2959_v34, %v2746_v0 }
0x20ee   :  { %v2747_v24 = vmul.f32 %v2958_v31, %v2741_v20  ;;  %v2754_v25 = vsel %vm152_vm2, %v2752_v23, 0.0 }
0x20ef   :  { %v2755_v27 = vrot.slane %v2754_v25, 4 }
0x20f0   :  { %v2753_v29 = vadd.f32 %v2959_v34, %v2747_v24 }
0x20f1   :  { %v2756_v30 = vadd.f32 %v2755_v27, %v2754_v25 }
0x20f2   :  { %v2761_v36 = vsel %vm152_vm2, %v2753_v29, 0.0 }
0x20f3   :  { %v2757_v41 = vrot.slane %v2756_v30, 2  ;;  %v2762_v43 = vrot.slane %v2761_v36, 4 }
0x20f5   :  { %v2758_v38 = vadd.f32 %v2757_v41, %v2756_v30  ;;  %v2763_v44 = vadd.f32 %v2762_v43, %v2761_v36 }
0x20f7   :  { %v2759_v10 = vrot.slane %v2758_v38, 1  ;;  %v2764_v47 = vrot.slane %v2763_v44, 2 }
0x20f9   :  { %v2765_v61 = vadd.f32 %v2764_v47, %v2763_v44  ;;  %v2760_v13 = vadd.f32 %v2759_v10, %v2758_v38 }
0x20fb   :  { %v2766_v48 = vrot.slane %v2765_v61, 1  ;;  %v2769_v18 = vmul.f32 0.125, %v2760_v13 }
0x20fd   :  { %v2767_v45 = vadd.f32 %v2766_v48, %v2765_v61 }
0x20ff   :  { %v2770_v26 = vmul.f32 0.125, %v2767_v45 }
0x2101   :  { %v2783_v46 = vsel %vm2782_vm7, %v2770_v26, %v2769_v18 }
0x2102   :  { %3335 = vmatmul.mubr.msk.f32.vlgmr.msra.gmra.mxu0 %vm152_vm2, %v2783_v46 }
0x21c2   :  { %v2852_v3 = vpop.f32.mrf.mxu0 }
0x21c3   :  { %v2853_v28 = vadd.f32 %v2960_v1, %v2852_v3 }
0x21c4   :  { %v3336_v49 = vpop.f32.mrf.mxu0 }
0x21c5   :  { %v2962_v50 = vmul.f32 -1.442695, %v2853_v28 }
0x21c7   :  { %3498 = vpow2.f32 %v2962_v50 }
0x21d4   :  { %v3499_v51 = vpop.eup %3498 }
0x21d5   :  { %v2859_v35 = vadd.f32 1.0, %v3499_v51 }
0x21d7   :  { %3500 = vrcp.f32 %v2859_v35 }
0x21e4   :  { %v3501_v54 = vpop.eup %3500 }
0x21e5   :  { %2863 = vst.msk [vmem:[#allocation5] sm:$0x3] %vm2862_vm8, %v3501_v54 }
0x21e6   :  { %3533 = shalt.err (!%p3530_p9)
}
0x21e7   :  { %2873 = dma.vmem_to_hbm [thread:$0]  %s2871_s28, 32, %s4235_s7, [#allocation4]  }
0x21e8   :  { %3544 = dma.done.wait [#allocation4], 32  }
0x21e9   :  { %3545 = vsyncadd [#allocation4], 4294967264 }
0x21ea   :  { %2877 = vsyncpa [#allocation3], 1 }
0x21eb   :  { %2878 = vsyncpa [#allocation4], 1 }

</bundles_post_ra>
